<compile_context>
chip_gen: v6e
topology: v6e:2x2x1
jax: 0.10.0
libtpu: 0.0.40
codegen_flags: <defaults>
</compile_context>

<pallas_src>
import functools

import jax
import jax.numpy as jnp
from jax.experimental import pallas as pl
from jax.experimental.pallas import tpu as pltpu

_LANE = 128
_SUBLANE_BF16 = 16  # packed bf16 sublane tile


def _round_up(x, m):
    return (x + m - 1) // m * m


def _device_kind():
    try:
        return jax.devices()[0].device_kind.lower()
    except Exception:  # pragma: no cover
        return ""


def _pick_batch_tile(b_padded, *, two_cores):
    """Chip-aware batch tile (multiple of 128 lanes dividing the padded batch)."""
    if not two_cores:
        # Single TensorCore (v5e/v6e): one big tile -> fewest pipeline steps,
        # largest MXU N per push.
        for cand in range(min(1024, b_padded), _LANE - 1, -_LANE):
            if b_padded % cand == 0:
                return cand
        return _LANE
    # Two TensorCores (v7x): tiny batches are weight-DMA bound -> don't split;
    # otherwise split evenly with tiles <= 512 lanes.
    if b_padded <= 2 * _LANE:
        return b_padded
    for cand in range(min(512, b_padded // 2), _LANE - 1, -_LANE):
        if b_padded % cand == 0:
            return cand
    return _LANE


# ----------------------------------------------------------------------------
# Pallas kernel: whole critic MLP fused per batch tile.  Activations are
# [features, batch_tile]; weights stay in PyTorch [out, in] orientation so
# each layer is W @ h on the MXU with f32 accumulation.
# ----------------------------------------------------------------------------
def _critic_kernel(x_ref,
                   w1_ref, b1_ref, w2_ref, b2_ref, w3_ref, b3_ref,
                   w4_ref, b4_ref, w5_ref, b5_ref,
                   o_ref, *, bf16_relu):
    h = x_ref[...]                                          # [S_p, tb] bf16
    for w_ref, b_ref in ((w1_ref, b1_ref), (w2_ref, b2_ref),
                         (w3_ref, b3_ref), (w4_ref, b4_ref)):
        acc = jnp.dot(w_ref[...], h,                        # MXU, bf16 operands
                      preferred_element_type=jnp.float32)   # f32 accumulate
        y = acc + b_ref[...]                                # f32 bias add
        if bf16_relu:
            # v6e/v7x: bf16-native VPU -> ReLU on packed [16,128] vregs.
            h = jnp.maximum(y.astype(jnp.bfloat16), 0)
        else:
            # v5e: no bf16 VPU -> ReLU in f32, single cast to bf16 afterwards.
            h = jnp.maximum(y, 0.0).astype(jnp.bfloat16)
    # 1-wide value head on the MXU: [1, H_p] @ [H_p, tb] -> lane-dense [1, tb].
    v = jnp.dot(w5_ref[...], h, preferred_element_type=jnp.float32) + b5_ref[...]
    o_ref[...] = v.astype(o_ref.dtype)


def critic_forward(state, params, *, batch_tile=None):
    """state: [B, state_dim] f32 -> value: [B, 1] f32."""
    B, S = state.shape
    (w1, b1), (w2, b2), (w3, b3), (w4, b4), (w5, b5) = params
    H_p, S_p = w1.shape
    assert S <= S_p, "state_dim larger than the params were initialized for"

    kind = _device_kind()
    two_cores = "7" in kind                                     # v7x: 2 TCs/chip
    bf16_relu = not any(t in kind for t in ("v2", "v3", "v4", "v5"))

    B_p = _round_up(B, _LANE)
    if batch_tile is None:
        tb = _pick_batch_tile(B_p, two_cores=two_cores)
    else:
        assert batch_tile % _LANE == 0, "batch_tile must be a multiple of 128"
        tb = batch_tile
        B_p = _round_up(B_p, tb)
    n_tiles = B_p // tb

    # Transposed bf16 activations: batch on lanes, features on sublanes.
    # Padded rows/cols are zero -> identical math for arbitrary B / state_dim.
    x_t = jnp.zeros((S_p, B_p), jnp.bfloat16).at[:S, :B].set(
        state.astype(jnp.bfloat16).T)

    weight_args = [w1, b1, w2, b2, w3, b3, w4, b4, w5, b5]

    def weight_specs(single_buffer):
        specs = []
        for a in weight_args:
            if single_buffer:
                # Grid-constant block: a second pipeline buffer is never
                # filled, so keep a single VMEM buffer.
                specs.append(pl.BlockSpec(a.shape, lambda i: (0, 0),
                                          pipeline_mode=pl.Buffered(1)))
            else:
                specs.append(pl.BlockSpec(a.shape, lambda i: (0, 0)))
        return specs

    def nbytes(a):
        return a.size * a.dtype.itemsize

    param_bytes = sum(nbytes(a) for a in weight_args)
    io_bytes = nbytes(x_t) + param_bytes + B_p * 4
    flops = 2 * B_p * (S_p * H_p + 3 * H_p * H_p + H_p)

    # VMEM: params (<=2 buffers), double-buffered x/out blocks, plus in-kernel
    # intermediates (f32 acc + bf16 h + slack) and fixed headroom.
    interm = H_p * tb * (4 + 2 + 2)
    vmem_needed = (2 * param_bytes + 2 * (S_p * tb * 2 + tb * 4)
                   + interm + (4 << 20))
    vmem_cap = (56 << 20) if two_cores else (100 << 20)
    vmem_limit = int(min(vmem_cap, max(32 << 20, vmem_needed)))

    if two_cores:
        # Only shard across the two TCs when each core gets >= 2 tiles
        # (otherwise the duplicated weight DMAs outweigh the compute win).
        semantics = ("parallel",) if n_tiles >= 4 else ("arbitrary",)
    else:
        semantics = ("parallel",) if n_tiles > 1 else ("arbitrary",)

    def run(single_buffer):
        return pl.pallas_call(
            functools.partial(_critic_kernel, bf16_relu=bf16_relu),
            out_shape=jax.ShapeDtypeStruct((1, B_p), jnp.float32),
            grid_spec=pltpu.PrefetchScalarGridSpec(
                num_scalar_prefetch=0,
                grid=(n_tiles,),
                in_specs=[pl.BlockSpec((S_p, tb), lambda i: (0, i))]
                         + weight_specs(single_buffer),
                out_specs=pl.BlockSpec((1, tb), lambda i: (0, i)),
            ),
            compiler_params=pltpu.CompilerParams(
                dimension_semantics=semantics,
                vmem_limit_bytes=vmem_limit),
            cost_estimate=pl.CostEstimate(
                flops=int(flops), transcendentals=0,
                bytes_accessed=int(io_bytes)),
        )(x_t, *weight_args)

    try:
        out = run(single_buffer=True)
    except Exception:
        # Fallback if Buffered(1) on grid-constant blocks is rejected by this
        # jax/Mosaic version; default double-buffering is functionally identical.
        out = run(single_buffer=False)

    return out[0, :B].reshape(B, 1)


# ----------------------------------------------------------------------------
# Deterministic parameter init (mimics nn.init.orthogonal_ + zero bias), in
# the kernel's padded layout.
# ----------------------------------------------------------------------------
def orthogonal_weight(key, out_dim, in_dim, gain=1.0):
    rows, cols = max(out_dim, in_dim), min(out_dim, in_dim)
    a = jax.random.normal(key, (rows, cols), dtype=jnp.float32)
    q, r = jnp.linalg.qr(a)
    d = jnp.sign(jnp.diag(r))
    d = jnp.where(d == 0, 1.0, d)            # avoid zeroing a row if diag==0
    q = q * d
    if out_dim < in_dim:
        q = q.T
    return gain * q[:out_dim, :in_dim]       # torch layout: [out, in]


def init_critic_params(key, state_dim, hidden_size):
    """Orthogonal init, zero-padded + packed for the kernel.

    hidden -> multiple of 128 lanes, state_dim -> multiple of 16 sublanes
    (bf16 packed tile).  Padded rows/cols are zero, so the padded network
    computes exactly the original module's value.  Weights are bf16 (MXU
    operands only); biases stay f32.  w5 is stored as a [1, H_p] bf16 row so
    the value head runs on the MXU.
    """
    s_p = _round_up(state_dim, _SUBLANE_BF16)
    h_p = _round_up(hidden_size, _LANE)

    shapes = [(hidden_size, state_dim, h_p, s_p),
              (hidden_size, hidden_size, h_p, h_p),
              (hidden_size, hidden_size, h_p, h_p),
              (hidden_size, hidden_size, h_p, h_p),
              (1, hidden_size, 1, h_p)]
    params = []
    for i, (d_out, d_in, p_out, p_in) in enumerate(shapes):
        k = jax.random.fold_in(key, i)
        w = orthogonal_weight(k, d_out, d_in)                      # [out, in]
        w = jnp.zeros((p_out, p_in), jnp.float32).at[:d_out, :d_in].set(w)
        w = w.astype(jnp.bfloat16)
        if i < 4:
            b = jnp.zeros((p_out, 1), jnp.float32)                 # column bias
        else:
            b = jnp.zeros((1, 1), jnp.float32)                     # scalar bias
        params.append((w, b))
    return params


def critic_reference(state, params):
    """Same math in plain JAX, standard [batch, features] layout."""
    (w1, b1), (w2, b2), (w3, b3), (w4, b4), (w5, b5) = params
    S_p = w1.shape[1]
    h = jnp.pad(state, ((0, 0), (0, S_p - state.shape[1]))).astype(jnp.bfloat16)
    for w, b in ((w1, b1), (w2, b2), (w3, b3), (w4, b4)):
        y = jnp.dot(h, w.T, preferred_element_type=jnp.float32) + b[:, 0]
        h = jnp.maximum(y, 0.0).astype(jnp.bfloat16)
    return jnp.dot(h, w5.T, preferred_element_type=jnp.float32) + b5[0, 0]


if __name__ == "__main__":
    key = jax.random.PRNGKey(0)
    B, state_dim, hidden = 8, 16, 32          # small test; production hidden=512

    state = jax.random.normal(jax.random.fold_in(key, 100), (B, state_dim),
                              dtype=jnp.float32)
    params = init_critic_params(jax.random.fold_in(key, 200), state_dim, hidden)

    value = jax.block_until_ready(critic_forward(state, params))
    ref = jax.block_until_ready(critic_reference(state, params))

    assert value.shape == (B, 1), value.shape
    err = float(jnp.max(jnp.abs(value - ref)))
    assert err < 2e-3, f"max abs err {err}"
    print("KERNEL_OK")
</pallas_src>

<mosaic_0001>
module attributes {stable_mosaic.version = 11 : i64} {
  func.func @_critic_kernel(%arg0: i32, %arg1: memref<16x128xbf16, #tpu.memory_space<vmem>>, %arg2: memref<128x16xbf16, #tpu.memory_space<vmem>>, %arg3: memref<128x1xf32, #tpu.memory_space<vmem>>, %arg4: memref<128x128xbf16, #tpu.memory_space<vmem>>, %arg5: memref<128x1xf32, #tpu.memory_space<vmem>>, %arg6: memref<128x128xbf16, #tpu.memory_space<vmem>>, %arg7: memref<128x1xf32, #tpu.memory_space<vmem>>, %arg8: memref<128x128xbf16, #tpu.memory_space<vmem>>, %arg9: memref<128x1xf32, #tpu.memory_space<vmem>>, %arg10: memref<1x128xbf16, #tpu.memory_space<vmem>>, %arg11: memref<1x1xf32, #tpu.memory_space<vmem>>, %arg12: memref<1x128xf32, #tpu.memory_space<vmem>>) attributes {dimension_semantics = [#tpu.dimension_semantics<arbitrary>], iteration_bounds = array<i64: 1>, scalar_prefetch = 0 : i64, scratch_operands = 0 : i64, tpu.core_type = #tpu.core_type<tc>, window_params = [{transform_indices = @transform_0, window_bounds = array<i64: 16, 128>}, {pipeline_mode = #tpu.pipeline_mode<synchronous>, transform_indices = @transform_1, window_bounds = array<i64: 128, 16>}, {pipeline_mode = #tpu.pipeline_mode<synchronous>, transform_indices = @transform_2, window_bounds = array<i64: 128, 1>}, {pipeline_mode = #tpu.pipeline_mode<synchronous>, transform_indices = @transform_3, window_bounds = array<i64: 128, 128>}, {pipeline_mode = #tpu.pipeline_mode<synchronous>, transform_indices = @transform_4, window_bounds = array<i64: 128, 1>}, {pipeline_mode = #tpu.pipeline_mode<synchronous>, transform_indices = @transform_5, window_bounds = array<i64: 128, 128>}, {pipeline_mode = #tpu.pipeline_mode<synchronous>, transform_indices = @transform_6, window_bounds = array<i64: 128, 1>}, {pipeline_mode = #tpu.pipeline_mode<synchronous>, transform_indices = @transform_7, window_bounds = array<i64: 128, 128>}, {pipeline_mode = #tpu.pipeline_mode<synchronous>, transform_indices = @transform_8, window_bounds = array<i64: 128, 1>}, {pipeline_mode = #tpu.pipeline_mode<synchronous>, transform_indices = @transform_9, window_bounds = array<i64: 1, 128>}, {pipeline_mode = #tpu.pipeline_mode<synchronous>, transform_indices = @transform_10, window_bounds = array<i64: 1, 1>}, {transform_indices = @transform_11, window_bounds = array<i64: 1, 128>}]} {
    %c0 = arith.constant 0 : index
    %c0_0 = arith.constant 0 : index
    %0 = vector.load %arg1[%c0, %c0_0] : memref<16x128xbf16, #tpu.memory_space<vmem>>, vector<16x128xbf16>
    %c0_1 = arith.constant 0 : index
    %c0_2 = arith.constant 0 : index
    %1 = vector.load %arg2[%c0_1, %c0_2] : memref<128x16xbf16, #tpu.memory_space<vmem>>, vector<128x16xbf16>
    %cst = arith.constant dense<0.000000e+00> : vector<128x128xf32>
    %2 = tpu.matmul %1, %0, %cst {dimension_numbers = #tpu.dot_dimension_numbers<[1], [0], [0], [1], [0, 0, 1, 1], [], []>} : vector<128x16xbf16>, vector<16x128xbf16>, vector<128x128xf32> -> vector<128x128xf32>
    %c0_3 = arith.constant 0 : index
    %c0_4 = arith.constant 0 : index
    %3 = vector.load %arg3[%c0_3, %c0_4] : memref<128x1xf32, #tpu.memory_space<vmem>>, vector<128x1xf32>
    %4 = vector.broadcast %3 : vector<128x1xf32> to vector<128x128xf32>
    %5 = arith.addf %2, %4 : vector<128x128xf32>
    %6 = arith.truncf %5 : vector<128x128xf32> to vector<128x128xbf16>
    %cst_5 = arith.constant 0.000000e+00 : bf16
    %7 = vector.broadcast %cst_5 : bf16 to vector<128x128xbf16>
    %8 = arith.maximumf %6, %7 : vector<128x128xbf16>
    %c0_6 = arith.constant 0 : index
    %c0_7 = arith.constant 0 : index
    %9 = vector.load %arg4[%c0_6, %c0_7] : memref<128x128xbf16, #tpu.memory_space<vmem>>, vector<128x128xbf16>
    %cst_8 = arith.constant dense<0.000000e+00> : vector<128x128xf32>
    %10 = tpu.matmul %9, %8, %cst_8 {dimension_numbers = #tpu.dot_dimension_numbers<[1], [0], [0], [1], [0, 0, 1, 1], [], []>} : vector<128x128xbf16>, vector<128x128xbf16>, vector<128x128xf32> -> vector<128x128xf32>
    %c0_9 = arith.constant 0 : index
    %c0_10 = arith.constant 0 : index
    %11 = vector.load %arg5[%c0_9, %c0_10] : memref<128x1xf32, #tpu.memory_space<vmem>>, vector<128x1xf32>
    %12 = vector.broadcast %11 : vector<128x1xf32> to vector<128x128xf32>
    %13 = arith.addf %10, %12 : vector<128x128xf32>
    %14 = arith.truncf %13 : vector<128x128xf32> to vector<128x128xbf16>
    %cst_11 = arith.constant 0.000000e+00 : bf16
    %15 = vector.broadcast %cst_11 : bf16 to vector<128x128xbf16>
    %16 = arith.maximumf %14, %15 : vector<128x128xbf16>
    %c0_12 = arith.constant 0 : index
    %c0_13 = arith.constant 0 : index
    %17 = vector.load %arg6[%c0_12, %c0_13] : memref<128x128xbf16, #tpu.memory_space<vmem>>, vector<128x128xbf16>
    %cst_14 = arith.constant dense<0.000000e+00> : vector<128x128xf32>
    %18 = tpu.matmul %17, %16, %cst_14 {dimension_numbers = #tpu.dot_dimension_numbers<[1], [0], [0], [1], [0, 0, 1, 1], [], []>} : vector<128x128xbf16>, vector<128x128xbf16>, vector<128x128xf32> -> vector<128x128xf32>
    %c0_15 = arith.constant 0 : index
    %c0_16 = arith.constant 0 : index
    %19 = vector.load %arg7[%c0_15, %c0_16] : memref<128x1xf32, #tpu.memory_space<vmem>>, vector<128x1xf32>
    %20 = vector.broadcast %19 : vector<128x1xf32> to vector<128x128xf32>
    %21 = arith.addf %18, %20 : vector<128x128xf32>
    %22 = arith.truncf %21 : vector<128x128xf32> to vector<128x128xbf16>
    %cst_17 = arith.constant 0.000000e+00 : bf16
    %23 = vector.broadcast %cst_17 : bf16 to vector<128x128xbf16>
    %24 = arith.maximumf %22, %23 : vector<128x128xbf16>
    %c0_18 = arith.constant 0 : index
    %c0_19 = arith.constant 0 : index
    %25 = vector.load %arg8[%c0_18, %c0_19] : memref<128x128xbf16, #tpu.memory_space<vmem>>, vector<128x128xbf16>
    %cst_20 = arith.constant dense<0.000000e+00> : vector<128x128xf32>
    %26 = tpu.matmul %25, %24, %cst_20 {dimension_numbers = #tpu.dot_dimension_numbers<[1], [0], [0], [1], [0, 0, 1, 1], [], []>} : vector<128x128xbf16>, vector<128x128xbf16>, vector<128x128xf32> -> vector<128x128xf32>
    %c0_21 = arith.constant 0 : index
    %c0_22 = arith.constant 0 : index
    %27 = vector.load %arg9[%c0_21, %c0_22] : memref<128x1xf32, #tpu.memory_space<vmem>>, vector<128x1xf32>
    %28 = vector.broadcast %27 : vector<128x1xf32> to vector<128x128xf32>
    %29 = arith.addf %26, %28 : vector<128x128xf32>
    %30 = arith.truncf %29 : vector<128x128xf32> to vector<128x128xbf16>
    %cst_23 = arith.constant 0.000000e+00 : bf16
    %31 = vector.broadcast %cst_23 : bf16 to vector<128x128xbf16>
    %32 = arith.maximumf %30, %31 : vector<128x128xbf16>
    %c0_24 = arith.constant 0 : index
    %c0_25 = arith.constant 0 : index
    %33 = vector.load %arg10[%c0_24, %c0_25] : memref<1x128xbf16, #tpu.memory_space<vmem>>, vector<1x128xbf16>
    %cst_26 = arith.constant dense<0.000000e+00> : vector<1x128xf32>
    %34 = tpu.matmul %33, %32, %cst_26 {dimension_numbers = #tpu.dot_dimension_numbers<[1], [0], [0], [1], [0, 0, 1, 1], [], []>} : vector<1x128xbf16>, vector<128x128xbf16>, vector<1x128xf32> -> vector<1x128xf32>
    %c0_27 = arith.constant 0 : index
    %c0_28 = arith.constant 0 : index
    %35 = vector.load %arg11[%c0_27, %c0_28] : memref<1x1xf32, #tpu.memory_space<vmem>>, vector<1x1xf32>
    %36 = vector.broadcast %35 : vector<1x1xf32> to vector<1x128xf32>
    %37 = arith.addf %34, %36 : vector<1x128xf32>
    %c0_29 = arith.constant 0 : index
    %c0_30 = arith.constant 0 : index
    %38 = vector.load %arg12[%c0_29, %c0_30] : memref<1x128xf32, #tpu.memory_space<vmem>>, vector<1x128xf32>
    tpu.vector_store %arg12[%c0_29, %c0_30], %37 {strides = array<i32>} : memref<1x128xf32, #tpu.memory_space<vmem>>, vector<1x128xf32>,
    return
  }
  func.func @transform_0(%arg0: i32) -> (i32, i32) {
    %c0_i32 = arith.constant 0 : i32
    %c0_i32_0 = arith.constant 0 : i32
    return %c0_i32, %arg0 : i32, i32
  }
  func.func @transform_1(%arg0: i32) -> (i32, i32) {
    %c0_i32 = arith.constant 0 : i32
    %c0_i32_0 = arith.constant 0 : i32
    %c0_i32_1 = arith.constant 0 : i32
    return %c0_i32, %c0_i32_0 : i32, i32
  }
  func.func @transform_2(%arg0: i32) -> (i32, i32) {
    %c0_i32 = arith.constant 0 : i32
    %c0_i32_0 = arith.constant 0 : i32
    %c0_i32_1 = arith.constant 0 : i32
    return %c0_i32, %c0_i32_0 : i32, i32
  }
  func.func @transform_3(%arg0: i32) -> (i32, i32) {
    %c0_i32 = arith.constant 0 : i32
    %c0_i32_0 = arith.constant 0 : i32
    %c0_i32_1 = arith.constant 0 : i32
    return %c0_i32, %c0_i32_0 : i32, i32
  }
  func.func @transform_4(%arg0: i32) -> (i32, i32) {
    %c0_i32 = arith.constant 0 : i32
    %c0_i32_0 = arith.constant 0 : i32
    %c0_i32_1 = arith.constant 0 : i32
    return %c0_i32, %c0_i32_0 : i32, i32
  }
  func.func @transform_5(%arg0: i32) -> (i32, i32) {
    %c0_i32 = arith.constant 0 : i32
    %c0_i32_0 = arith.constant 0 : i32
    %c0_i32_1 = arith.constant 0 : i32
    return %c0_i32, %c0_i32_0 : i32, i32
  }
  func.func @transform_6(%arg0: i32) -> (i32, i32) {
    %c0_i32 = arith.constant 0 : i32
    %c0_i32_0 = arith.constant 0 : i32
    %c0_i32_1 = arith.constant 0 : i32
    return %c0_i32, %c0_i32_0 : i32, i32
  }
  func.func @transform_7(%arg0: i32) -> (i32, i32) {
    %c0_i32 = arith.constant 0 : i32
    %c0_i32_0 = arith.constant 0 : i32
    %c0_i32_1 = arith.constant 0 : i32
    return %c0_i32, %c0_i32_0 : i32, i32
  }
  func.func @transform_8(%arg0: i32) -> (i32, i32) {
    %c0_i32 = arith.constant 0 : i32
    %c0_i32_0 = arith.constant 0 : i32
    %c0_i32_1 = arith.constant 0 : i32
    return %c0_i32, %c0_i32_0 : i32, i32
  }
  func.func @transform_9(%arg0: i32) -> (i32, i32) {
    %c0_i32 = arith.constant 0 : i32
    %c0_i32_0 = arith.constant 0 : i32
    %c0_i32_1 = arith.constant 0 : i32
    return %c0_i32, %c0_i32_0 : i32, i32
  }
  func.func @transform_10(%arg0: i32) -> (i32, i32) {
    %c0_i32 = arith.constant 0 : i32
    %c0_i32_0 = arith.constant 0 : i32
    %c0_i32_1 = arith.constant 0 : i32
    return %c0_i32, %c0_i32_0 : i32, i32
  }
  func.func @transform_11(%arg0: i32) -> (i32, i32) {
    %c0_i32 = arith.constant 0 : i32
    %c0_i32_0 = arith.constant 0 : i32
    return %c0_i32, %arg0 : i32, i32
  }
}

module attributes {stable_mosaic.version = 11 : i64} {
  func.func @_critic_kernel(%arg0: i32, %arg1: memref<16x128xbf16, #tpu.memory_space<vmem>>, %arg2: memref<128x16xbf16, #tpu.memory_space<vmem>>, %arg3: memref<128x1xf32, #tpu.memory_space<vmem>>, %arg4: memref<128x128xbf16, #tpu.memory_space<vmem>>, %arg5: memref<128x1xf32, #tpu.memory_space<vmem>>, %arg6: memref<128x128xbf16, #tpu.memory_space<vmem>>, %arg7: memref<128x1xf32, #tpu.memory_space<vmem>>, %arg8: memref<128x128xbf16, #tpu.memory_space<vmem>>, %arg9: memref<128x1xf32, #tpu.memory_space<vmem>>, %arg10: memref<1x128xbf16, #tpu.memory_space<vmem>>, %arg11: memref<1x1xf32, #tpu.memory_space<vmem>>, %arg12: memref<1x128xf32, #tpu.memory_space<vmem>>) attributes {dimension_semantics = [#tpu.dimension_semantics<arbitrary>], iteration_bounds = array<i64: 1>, scalar_prefetch = 0 : i64, scratch_operands = 0 : i64, tpu.core_type = #tpu.core_type<tc>, window_params = [{transform_indices = @transform_0, window_bounds = array<i64: 16, 128>}, {pipeline_mode = #tpu.pipeline_mode<synchronous>, transform_indices = @transform_1, window_bounds = array<i64: 128, 16>}, {pipeline_mode = #tpu.pipeline_mode<synchronous>, transform_indices = @transform_2, window_bounds = array<i64: 128, 1>}, {pipeline_mode = #tpu.pipeline_mode<synchronous>, transform_indices = @transform_3, window_bounds = array<i64: 128, 128>}, {pipeline_mode = #tpu.pipeline_mode<synchronous>, transform_indices = @transform_4, window_bounds = array<i64: 128, 1>}, {pipeline_mode = #tpu.pipeline_mode<synchronous>, transform_indices = @transform_5, window_bounds = array<i64: 128, 128>}, {pipeline_mode = #tpu.pipeline_mode<synchronous>, transform_indices = @transform_6, window_bounds = array<i64: 128, 1>}, {pipeline_mode = #tpu.pipeline_mode<synchronous>, transform_indices = @transform_7, window_bounds = array<i64: 128, 128>}, {pipeline_mode = #tpu.pipeline_mode<synchronous>, transform_indices = @transform_8, window_bounds = array<i64: 128, 1>}, {pipeline_mode = #tpu.pipeline_mode<synchronous>, transform_indices = @transform_9, window_bounds = array<i64: 1, 128>}, {pipeline_mode = #tpu.pipeline_mode<synchronous>, transform_indices = @transform_10, window_bounds = array<i64: 1, 1>}, {transform_indices = @transform_11, window_bounds = array<i64: 1, 128>}]} {
    %c0 = arith.constant 0 : index
    %c0_0 = arith.constant 0 : index
    %0 = vector.load %arg1[%c0, %c0_0] : memref<16x128xbf16, #tpu.memory_space<vmem>>, vector<16x128xbf16>
    %c0_1 = arith.constant 0 : index
    %c0_2 = arith.constant 0 : index
    %1 = vector.load %arg2[%c0_1, %c0_2] : memref<128x16xbf16, #tpu.memory_space<vmem>>, vector<128x16xbf16>
    %cst = arith.constant dense<0.000000e+00> : vector<128x128xf32>
    %2 = tpu.matmul %1, %0, %cst {dimension_numbers = #tpu.dot_dimension_numbers<[1], [0], [0], [1], [0, 0, 1, 1], [], []>} : vector<128x16xbf16>, vector<16x128xbf16>, vector<128x128xf32> -> vector<128x128xf32>
    %c0_3 = arith.constant 0 : index
    %c0_4 = arith.constant 0 : index
    %3 = vector.load %arg3[%c0_3, %c0_4] : memref<128x1xf32, #tpu.memory_space<vmem>>, vector<128x1xf32>
    %4 = vector.broadcast %3 : vector<128x1xf32> to vector<128x128xf32>
    %5 = arith.addf %2, %4 : vector<128x128xf32>
    %6 = arith.truncf %5 : vector<128x128xf32> to vector<128x128xbf16>
    %cst_5 = arith.constant 0.000000e+00 : bf16
    %7 = vector.broadcast %cst_5 : bf16 to vector<128x128xbf16>
    %8 = arith.maximumf %6, %7 : vector<128x128xbf16>
    %c0_6 = arith.constant 0 : index
    %c0_7 = arith.constant 0 : index
    %9 = vector.load %arg4[%c0_6, %c0_7] : memref<128x128xbf16, #tpu.memory_space<vmem>>, vector<128x128xbf16>
    %cst_8 = arith.constant dense<0.000000e+00> : vector<128x128xf32>
    %10 = tpu.matmul %9, %8, %cst_8 {dimension_numbers = #tpu.dot_dimension_numbers<[1], [0], [0], [1], [0, 0, 1, 1], [], []>} : vector<128x128xbf16>, vector<128x128xbf16>, vector<128x128xf32> -> vector<128x128xf32>
    %c0_9 = arith.constant 0 : index
    %c0_10 = arith.constant 0 : index
    %11 = vector.load %arg5[%c0_9, %c0_10] : memref<128x1xf32, #tpu.memory_space<vmem>>, vector<128x1xf32>
    %12 = vector.broadcast %11 : vector<128x1xf32> to vector<128x128xf32>
    %13 = arith.addf %10, %12 : vector<128x128xf32>
    %14 = arith.truncf %13 : vector<128x128xf32> to vector<128x128xbf16>
    %cst_11 = arith.constant 0.000000e+00 : bf16
    %15 = vector.broadcast %cst_11 : bf16 to vector<128x128xbf16>
    %16 = arith.maximumf %14, %15 : vector<128x128xbf16>
    %c0_12 = arith.constant 0 : index
    %c0_13 = arith.constant 0 : index
    %17 = vector.load %arg6[%c0_12, %c0_13] : memref<128x128xbf16, #tpu.memory_space<vmem>>, vector<128x128xbf16>
    %cst_14 = arith.constant dense<0.000000e+00> : vector<128x128xf32>
    %18 = tpu.matmul %17, %16, %cst_14 {dimension_numbers = #tpu.dot_dimension_numbers<[1], [0], [0], [1], [0, 0, 1, 1], [], []>} : vector<128x128xbf16>, vector<128x128xbf16>, vector<128x128xf32> -> vector<128x128xf32>
    %c0_15 = arith.constant 0 : index
    %c0_16 = arith.constant 0 : index
    %19 = vector.load %arg7[%c0_15, %c0_16] : memref<128x1xf32, #tpu.memory_space<vmem>>, vector<128x1xf32>
    %20 = vector.broadcast %19 : vector<128x1xf32> to vector<128x128xf32>
    %21 = arith.addf %18, %20 : vector<128x128xf32>
    %22 = arith.truncf %21 : vector<128x128xf32> to vector<128x128xbf16>
    %cst_17 = arith.constant 0.000000e+00 : bf16
    %23 = vector.broadcast %cst_17 : bf16 to vector<128x128xbf16>
    %24 = arith.maximumf %22, %23 : vector<128x128xbf16>
    %c0_18 = arith.constant 0 : index
    %c0_19 = arith.constant 0 : index
    %25 = vector.load %arg8[%c0_18, %c0_19] : memref<128x128xbf16, #tpu.memory_space<vmem>>, vector<128x128xbf16>
    %cst_20 = arith.constant dense<0.000000e+00> : vector<128x128xf32>
    %26 = tpu.matmul %25, %24, %cst_20 {dimension_numbers = #tpu.dot_dimension_numbers<[1], [0], [0], [1], [0, 0, 1, 1], [], []>} : vector<128x128xbf16>, vector<128x128xbf16>, vector<128x128xf32> -> vector<128x128xf32>
    %c0_21 = arith.constant 0 : index
    %c0_22 = arith.constant 0 : index
    %27 = vector.load %arg9[%c0_21, %c0_22] : memref<128x1xf32, #tpu.memory_space<vmem>>, vector<128x1xf32>
    %28 = vector.broadcast %27 : vector<128x1xf32> to vector<128x128xf32>
    %29 = arith.addf %26, %28 : vector<128x128xf32>
    %30 = arith.truncf %29 : vector<128x128xf32> to vector<128x128xbf16>
    %cst_23 = arith.constant 0.000000e+00 : bf16
    %31 = vector.broadcast %cst_23 : bf16 to vector<128x128xbf16>
    %32 = arith.maximumf %30, %31 : vector<128x128xbf16>
    %c0_24 = arith.constant 0 : index
    %c0_25 = arith.constant 0 : index
    %33 = vector.load %arg10[%c0_24, %c0_25] : memref<1x128xbf16, #tpu.memory_space<vmem>>, vector<1x128xbf16>
    %cst_26 = arith.constant dense<0.000000e+00> : vector<1x128xf32>
    %34 = tpu.matmul %33, %32, %cst_26 {dimension_numbers = #tpu.dot_dimension_numbers<[1], [0], [0], [1], [0, 0, 1, 1], [], []>} : vector<1x128xbf16>, vector<128x128xbf16>, vector<1x128xf32> -> vector<1x128xf32>
    %c0_27 = arith.constant 0 : index
    %c0_28 = arith.constant 0 : index
    %35 = vector.load %arg11[%c0_27, %c0_28] : memref<1x1xf32, #tpu.memory_space<vmem>>, vector<1x1xf32>
    %36 = vector.broadcast %35 : vector<1x1xf32> to vector<1x128xf32>
    %37 = arith.addf %34, %36 : vector<1x128xf32>
    %c0_29 = arith.constant 0 : index
    %c0_30 = arith.constant 0 : index
    %38 = vector.load %arg12[%c0_29, %c0_30] : memref<1x128xf32, #tpu.memory_space<vmem>>, vector<1x128xf32>
    tpu.vector_store %arg12[%c0_29, %c0_30], %37 {strides = array<i32>} : memref<1x128xf32, #tpu.memory_space<vmem>>, vector<1x128xf32>,
    return
  }
  func.func @transform_0(%arg0: i32) -> (i32, i32) {
    %c0_i32 = arith.constant 0 : i32
    %c0_i32_0 = arith.constant 0 : i32
    return %c0_i32, %arg0 : i32, i32
  }
  func.func @transform_1(%arg0: i32) -> (i32, i32) {
    %c0_i32 = arith.constant 0 : i32
    %c0_i32_0 = arith.constant 0 : i32
    %c0_i32_1 = arith.constant 0 : i32
    return %c0_i32, %c0_i32_0 : i32, i32
  }
  func.func @transform_2(%arg0: i32) -> (i32, i32) {
    %c0_i32 = arith.constant 0 : i32
    %c0_i32_0 = arith.constant 0 : i32
    %c0_i32_1 = arith.constant 0 : i32
    return %c0_i32, %c0_i32_0 : i32, i32
  }
  func.func @transform_3(%arg0: i32) -> (i32, i32) {
    %c0_i32 = arith.constant 0 : i32
    %c0_i32_0 = arith.constant 0 : i32
    %c0_i32_1 = arith.constant 0 : i32
    return %c0_i32, %c0_i32_0 : i32, i32
  }
  func.func @transform_4(%arg0: i32) -> (i32, i32) {
    %c0_i32 = arith.constant 0 : i32
    %c0_i32_0 = arith.constant 0 : i32
    %c0_i32_1 = arith.constant 0 : i32
    return %c0_i32, %c0_i32_0 : i32, i32
  }
  func.func @transform_5(%arg0: i32) -> (i32, i32) {
    %c0_i32 = arith.constant 0 : i32
    %c0_i32_0 = arith.constant 0 : i32
    %c0_i32_1 = arith.constant 0 : i32
    return %c0_i32, %c0_i32_0 : i32, i32
  }
  func.func @transform_6(%arg0: i32) -> (i32, i32) {
    %c0_i32 = arith.constant 0 : i32
    %c0_i32_0 = arith.constant 0 : i32
    %c0_i32_1 = arith.constant 0 : i32
    return %c0_i32, %c0_i32_0 : i32, i32
  }
  func.func @transform_7(%arg0: i32) -> (i32, i32) {
    %c0_i32 = arith.constant 0 : i32
    %c0_i32_0 = arith.constant 0 : i32
    %c0_i32_1 = arith.constant 0 : i32
    return %c0_i32, %c0_i32_0 : i32, i32
  }
  func.func @transform_8(%arg0: i32) -> (i32, i32) {
    %c0_i32 = arith.constant 0 : i32
    %c0_i32_0 = arith.constant 0 : i32
    %c0_i32_1 = arith.constant 0 : i32
    return %c0_i32, %c0_i32_0 : i32, i32
  }
  func.func @transform_9(%arg0: i32) -> (i32, i32) {
    %c0_i32 = arith.constant 0 : i32
    %c0_i32_0 = arith.constant 0 : i32
    %c0_i32_1 = arith.constant 0 : i32
    return %c0_i32, %c0_i32_0 : i32, i32
  }
  func.func @transform_10(%arg0: i32) -> (i32, i32) {
    %c0_i32 = arith.constant 0 : i32
    %c0_i32_0 = arith.constant 0 : i32
    %c0_i32_1 = arith.constant 0 : i32
    return %c0_i32, %c0_i32_0 : i32, i32
  }
  func.func @transform_11(%arg0: i32) -> (i32, i32) {
    %c0_i32 = arith.constant 0 : i32
    %c0_i32_0 = arith.constant 0 : i32
    return %c0_i32, %arg0 : i32, i32
  }
}

</mosaic_0001>

<bundles_post_ra>
// kernel: tpu_custom_call.1
= control target key start
LH: loop header
LB: loop body
LE: loop exit
PB: predicated region body
PF: predicated region fallthrough
CT: control target
= control target key end

     0   :  { %s1966_s0 = inlined_call_operand.vmem [shape: bf16[16,128], index: 0, kind: input, shape index: {}]   ;;  %s1967_s1 = inlined_call_operand.vmem [shape: bf16[128,16], index: 1, kind: input, shape index: {}]   ;;  %s1968_s2 = inlined_call_operand.vmem [shape: f32[128,1], index: 2, kind: input, shape index: {}]   ;;  %s1969_s3 = inlined_call_operand.vmem [shape: bf16[128,128], index: 3, kind: input, shape index: {}]   ;;  %s1970_s4 = inlined_call_operand.vmem [shape: f32[128,1], index: 4, kind: input, shape index: {}]   ;;  %s1971_s5 = inlined_call_operand.vmem [shape: bf16[128,128], index: 5, kind: input, shape index: {}]   ;;  %s1972_s6 = inlined_call_operand.vmem [shape: f32[128,1], index: 6, kind: input, shape index: {}]   ;;  %s1973_s7 = inlined_call_operand.vmem [shape: bf16[128,128], index: 7, kind: input, shape index: {}]   ;;  %s1974_s8 = inlined_call_operand.vmem [shape: f32[128,1], index: 8, kind: input, shape index: {}]   ;;  %s1975_s9 = inlined_call_operand.vmem [shape: bf16[1,128], index: 9, kind: input, shape index: {}]   ;;  %s1976_s10 = inlined_call_operand.<no memory space> [shape: f32[1,1], index: 10, kind: input, shape index: {}]   ;;  %s1977_s11 = inlined_call_operand.hbm [shape: f32[1,128], index: 11, kind: output, shape index: {}]  }
   0x1   :  { %v16_v0 = vstv %s1976_s10 }
   0x2   :  { %17 = vst [vmem:[#allocation2] sm:$0x1] %v16_v0 }
   0x3   :  { %v74_v1 = vld [vmem:[%s1968_s2 + $0x70] sm:$0xff]  ;;  %v72_v2 = vld [vmem:[%s1968_s2 + $0x60] sm:$0xff]  ;;  %v1527_v3 = vmov 0   ;;  %v75_v5 = vld [vmem:[%s1968_s2 + $0x78] sm:$0xff]  ;;  %vm202_vm0 = vcmask 130048  }
   0x4   :  { %1471 = vset.pattern.permute.xlu1 %v1527_v3  ;;  %1470 = vset.pattern.permute.xlu0 %v1527_v3  ;;  %v1472_v4 = vld [vmem:[%s1966_s0] sm:$0xff]   ;;  %v73_v6 = vld [vmem:[%s1968_s2 + $0x68] sm:$0xff]  ;;  %v1475_v9 = vld [vmem:[%s1967_s1 + $0x10] sm:$0xff]  }
   0x5   :  { %148 = vperm.xlu0 %1470, %v74_v1   ;;  %138 = vperm.xlu1 %1471, %v72_v2   ;;  %v1473_v7 = vld [vmem:[%s1967_s1] sm:$0xff]   ;;  %v1474_v8 = vld [vmem:[%s1967_s1 + $0x8] sm:$0xff]   ;;  %v71_v10 = vld [vmem:[%s1968_s2 + $0x58] sm:$0xff] }
   0x6   :  { %1332 = vmatprep.subr.bf16.mxu0 %v1472_v4  ;;  %1334 = vmatprep.mubr.msk.bf16.mxu0 %vm202_vm0, %v1473_v7  ;;  %v70_v11 = vld [vmem:[%s1968_s2 + $0x50] sm:$0xff]  ;;  %v69_v12 = vld [vmem:[%s1968_s2 + $0x48] sm:$0xff]  ;;  %v68_v13 = vld [vmem:[%s1968_s2 + $0x40] sm:$0xff] }
   0x7   :  { %1333 = vmatpush3.bf16.msra.mxu0 %v1472_v4  ;;  %v1476_v14 = vld [vmem:[%s1967_s1 + $0x18] sm:$0xff]   ;;  %v1477_v15 = vld [vmem:[%s1967_s1 + $0x20] sm:$0xff]   ;;  %v66_v17 = vld [vmem:[%s1968_s2 + $0x30] sm:$0xff] }
   0x8   :  { %v67_v16 = vld [vmem:[%s1968_s2 + $0x38] sm:$0xff]  ;;  %v65_v18 = vld [vmem:[%s1968_s2 + $0x28] sm:$0xff]  ;;  %v64_v19 = vld [vmem:[%s1968_s2 + $0x20] sm:$0xff] }
   0x9   :  { %153 = vperm.xlu0 %1470, %v75_v5   ;;  %143 = vperm.xlu1 %1471, %v73_v6   ;;  %v1478_v20 = vld [vmem:[%s1967_s1 + $0x28] sm:$0xff]   ;;  %v1479_v21 = vld [vmem:[%s1967_s1 + $0x30] sm:$0xff]   ;;  %v63_v22 = vld [vmem:[%s1968_s2 + $0x18] sm:$0xff] }
   0xa   :  { %1335 = vmatmul.mubr.msk.bf16.vlgmr.msra.gmra.mxu0 %vm202_vm0, %v1474_v8  ;;  %v62_v23 = vld [vmem:[%s1968_s2 + $0x10] sm:$0xff]  ;;  %v61_v24 = vld [vmem:[%s1968_s2 + $0x8] sm:$0xff]  ;;  %v60_v25 = vld [vmem:[%s1968_s2] sm:$0xff] }
   0xb   :  { %1338 = vmatprep.mubr.msk.bf16.mxu0 %vm202_vm0, %v1475_v9  ;;  %v1480_v26 = vld [vmem:[%s1967_s1 + $0x38] sm:$0xff]   ;;  %v370_v28 = vld [vmem:[%s1970_s4 + $0x70] sm:$0xff]  ;;  %v369_v29 = vld [vmem:[%s1970_s4 + $0x68] sm:$0xff] }
   0xc   :  { %v371_v27 = vld [vmem:[%s1970_s4 + $0x78] sm:$0xff]  ;;  %v368_v30 = vld [vmem:[%s1970_s4 + $0x60] sm:$0xff]  ;;  %v366_v32 = vld [vmem:[%s1970_s4 + $0x50] sm:$0xff] }
   0xd   :  { %133 = vperm.xlu1 %1471, %v71_v10   ;;  %128 = vperm.xlu0 %1470, %v70_v11   ;;  %v367_v31 = vld [vmem:[%s1970_s4 + $0x58] sm:$0xff]  ;;  %v365_v33 = vld [vmem:[%s1970_s4 + $0x48] sm:$0xff]  ;;  %v364_v34 = vld [vmem:[%s1970_s4 + $0x40] sm:$0xff] }
  0x11   :  { %123 = vperm.xlu1 %1471, %v69_v12   ;;  %118 = vperm.xlu0 %1470, %v68_v13  }
  0x12   :  { %1339 = vmatmul.mubr.msk.bf16.gmra.mxu0 %vm202_vm0, %v1476_v14 }
  0x13   :  { %1342 = vmatprep.mubr.msk.bf16.mxu0 %vm202_vm0, %v1477_v15 }
  0x15   :  { %113 = vperm.xlu1 %1471, %v67_v16   ;;  %108 = vperm.xlu0 %1470, %v66_v17  }
  0x19   :  { %103 = vperm.xlu1 %1471, %v65_v18   ;;  %98 = vperm.xlu0 %1470, %v64_v19  }
  0x1a   :  { %1343 = vmatmul.mubr.msk.bf16.gmra.mxu0 %vm202_vm0, %v1478_v20 }
  0x1b   :  { %1346 = vmatprep.mubr.msk.bf16.mxu0 %vm202_vm0, %v1479_v21 }
  0x1d   :  { %93 = vperm.xlu1 %1471, %v63_v22   ;;  %88 = vperm.xlu0 %1470, %v62_v23  }
  0x21   :  { %83 = vperm.xlu1 %1471, %v61_v24   ;;  %78 = vperm.xlu0 %1470, %v60_v25  }
  0x22   :  { %1347 = vmatmul.mubr.msk.bf16.gmra.mxu0 %vm202_vm0, %v1480_v26 }
  0x25   :  { %449 = vperm.xlu1 %1471, %v371_v27   ;;  %444 = vperm.xlu0 %1470, %v370_v28  }
  0x29   :  { %439 = vperm.xlu1 %1471, %v369_v29   ;;  %434 = vperm.xlu0 %1470, %v368_v30  }
  0x2d   :  { %429 = vperm.xlu1 %1471, %v367_v31   ;;  %424 = vperm.xlu0 %1470, %v366_v32  }
  0x31   :  { %419 = vperm.xlu1 %1471, %v365_v33   ;;  %414 = vperm.xlu0 %1470, %v364_v34  }
  0x32   :  { %18 = vsyncpa [#allocation4], 0  ;;  %v363_v35 = vld [vmem:[%s1970_s4 + $0x38] sm:$0xff]  ;;  %v362_v36 = vld [vmem:[%s1970_s4 + $0x30] sm:$0xff]  ;;  %vm1529_vm1 = vmmov 0   ;;  %s1530_s21 = smov [#allocation3]  }
  0x33   :  { %v361_v37 = vld [vmem:[%s1970_s4 + $0x28] sm:$0xff]  ;;  %v360_v38 = vld [vmem:[%s1970_s4 + $0x20] sm:$0xff]  ;;  %v359_v39 = vld [vmem:[%s1970_s4 + $0x18] sm:$0xff]  ;;  %s1217_s22 = sshll.u32 %s1530_s21, 4  ;;  %s1218_s22 = int_to_ptr.vmem [resolvable:$true] %s1217_s22 }
  0x34   :  { %v358_v40 = vld [vmem:[%s1970_s4 + $0x10] sm:$0xff]  ;;  %v357_v41 = vld [vmem:[%s1970_s4 + $0x8] sm:$0xff]  ;;  %v356_v42 = vld [vmem:[%s1970_s4] sm:$0xff]  ;;  %s1505_s23 = scalar_lea.vmem %s1218_s22, 16  ;;  %s1509_s24 = scalar_lea.vmem %s1218_s22, 32 }
  0x35   :  { %409 = vperm.xlu1 %1471, %v363_v35   ;;  %404 = vperm.xlu0 %1470, %v362_v36   ;;  %v644_v43 = vld [vmem:[%s1972_s6 + $0x78] sm:$0xff]  ;;  %v643_v44 = vld [vmem:[%s1972_s6 + $0x70] sm:$0xff]  ;;  %v642_v45 = vld [vmem:[%s1972_s6 + $0x68] sm:$0xff]  ;;  %p1506_p0 = scmp.ne.s32.totalorder %s1218_s22, %s1505_s23  ;;  %p1510_p1 = scmp.lt.s32.totalorder %s1218_s22, %s1218_s22 }
  0x36   :  { %v641_v46 = vld [vmem:[%s1972_s6 + $0x60] sm:$0xff]  ;;  %v640_v47 = vld [vmem:[%s1972_s6 + $0x58] sm:$0xff]  ;;  %v639_v48 = vld [vmem:[%s1972_s6 + $0x50] sm:$0xff]  ;;  %p1511_p2 = scmp.lt.s32.totalorder %s1509_s24, %s1505_s23 }
  0x37   :  { %v638_v49 = vld [vmem:[%s1972_s6 + $0x48] sm:$0xff]  ;;  %v637_v50 = vld [vmem:[%s1972_s6 + $0x40] sm:$0xff]  ;;  %v636_v51 = vld [vmem:[%s1972_s6 + $0x38] sm:$0xff] }
  0x38   :  { %v635_v52 = vld [vmem:[%s1972_s6 + $0x30] sm:$0xff]  ;;  %v634_v53 = vld [vmem:[%s1972_s6 + $0x28] sm:$0xff]  ;;  %v633_v54 = vld [vmem:[%s1972_s6 + $0x20] sm:$0xff]  ;;  %p1512_p3 = por %p1511_p2, %p1510_p1 }
  0x39   :  { %399 = vperm.xlu1 %1471, %v361_v37   ;;  %394 = vperm.xlu0 %1470, %v360_v38   ;;  %v632_v55 = vld [vmem:[%s1972_s6 + $0x18] sm:$0xff]  ;;  %v631_v56 = vld [vmem:[%s1972_s6 + $0x10] sm:$0xff]  ;;  %v630_v57 = vld [vmem:[%s1972_s6 + $0x8] sm:$0xff] }
  0x3a   :  { %v629_v58 = vld [vmem:[%s1972_s6] sm:$0xff]  ;;  %v917_v59 = vld [vmem:[%s1974_s8 + $0x78] sm:$0xff]  ;;  %v916_v60 = vld [vmem:[%s1974_s8 + $0x70] sm:$0xff]  ;;  %p1513_p4 = pnand %p1512_p3, %p1506_p0 }
  0x3b   :  { %v915_v61 = vld [vmem:[%s1974_s8 + $0x68] sm:$0xff]  ;;  %v914_v62 = vld [vmem:[%s1974_s8 + $0x60] sm:$0xff]  ;;  %v913_v63 = vld [vmem:[%s1974_s8 + $0x58] sm:$0xff] }
  0x3c   :  { %v912_v0 = vld [vmem:[%s1974_s8 + $0x50] sm:$0xff]  ;;  %v911_v1 = vld [vmem:[%s1974_s8 + $0x48] sm:$0xff]  ;;  %v910_v2 = vld [vmem:[%s1974_s8 + $0x40] sm:$0xff] }
  0x3d   :  { %389 = vperm.xlu1 %1471, %v359_v39   ;;  %384 = vperm.xlu0 %1470, %v358_v40   ;;  %v909_v4 = vld [vmem:[%s1974_s8 + $0x38] sm:$0xff]  ;;  %v908_v5 = vld [vmem:[%s1974_s8 + $0x30] sm:$0xff]  ;;  %v907_v6 = vld [vmem:[%s1974_s8 + $0x28] sm:$0xff] }
  0x3e   :  { %v906_v7 = vld [vmem:[%s1974_s8 + $0x20] sm:$0xff]  ;;  %v905_v8 = vld [vmem:[%s1974_s8 + $0x18] sm:$0xff]  ;;  %v904_v9 = vld [vmem:[%s1974_s8 + $0x10] sm:$0xff] }
  0x3f   :  { %v903_v10 = vld [vmem:[%s1974_s8 + $0x8] sm:$0xff]  ;;  %v902_v11 = vld [vmem:[%s1974_s8] sm:$0xff] }
  0x40   :  { %v1160_v12 = vld [vmem:[#allocation2] sm:$0x1] }
  0x41   :  { %379 = vperm.xlu1 %1471, %v357_v41   ;;  %374 = vperm.xlu0 %1470, %v356_v42   ;;  %v1481_v13 = vld [vmem:[%s1969_s3] sm:$0xff]  }
  0x42   :  { %1366 = vmatprep.mubr.bf16.mxu1 %v1481_v13 }
  0x45   :  { %722 = vperm.xlu1 %1471, %v644_v43   ;;  %717 = vperm.xlu0 %1470, %v643_v44  }
  0x49   :  { %712 = vperm.xlu1 %1471, %v642_v45   ;;  %707 = vperm.xlu0 %1470, %v641_v46  }
  0x4d   :  { %702 = vperm.xlu1 %1471, %v640_v47   ;;  %697 = vperm.xlu0 %1470, %v639_v48  }
  0x51   :  { %692 = vperm.xlu1 %1471, %v638_v49   ;;  %687 = vperm.xlu0 %1470, %v637_v50  }
  0x55   :  { %682 = vperm.xlu1 %1471, %v636_v51   ;;  %677 = vperm.xlu0 %1470, %v635_v52  }
  0x59   :  { %672 = vperm.xlu1 %1471, %v634_v53   ;;  %667 = vperm.xlu0 %1470, %v633_v54  }
  0x5d   :  { %662 = vperm.xlu1 %1471, %v632_v55   ;;  %657 = vperm.xlu0 %1470, %v631_v56  }
  0x61   :  { %652 = vperm.xlu1 %1471, %v630_v57   ;;  %647 = vperm.xlu0 %1470, %v629_v58  }
  0x65   :  { %995 = vperm.xlu1 %1471, %v917_v59   ;;  %990 = vperm.xlu0 %1470, %v916_v60  }
  0x69   :  { %985 = vperm.xlu1 %1471, %v915_v61   ;;  %980 = vperm.xlu0 %1470, %v914_v62  }
  0x6d   :  { %975 = vperm.xlu1 %1471, %v913_v63   ;;  %970 = vperm.xlu0 %1470, %v912_v0  }
  0x71   :  { %965 = vperm.xlu1 %1471, %v911_v1   ;;  %960 = vperm.xlu0 %1470, %v910_v2  }
  0x75   :  { %955 = vperm.xlu1 %1471, %v909_v4   ;;  %950 = vperm.xlu0 %1470, %v908_v5  }
  0x79   :  { %945 = vperm.xlu1 %1471, %v907_v6   ;;  %940 = vperm.xlu0 %1470, %v906_v7  }
  0x7d   :  { %935 = vperm.xlu1 %1471, %v905_v8   ;;  %930 = vperm.xlu0 %1470, %v904_v9  }
  0x80   :  { %v139_v18 = vpop.permute.xlu1 %138  ;;  %v149_v20 = vpop.permute.xlu0 %148 }
  0x81   :  { %925 = vperm.xlu1 %1471, %v903_v10   ;;  %920 = vperm.xlu0 %1470, %v902_v11  }
  0x84   :  { %v144_v23 = vpop.permute.xlu1 %143  ;;  %v154_v25 = vpop.permute.xlu0 %153 }
  0x85   :  { %1163 = vperm.xlu0 %1470, %v1160_v12  }
  0x88   :  { %v134_v28 = vpop.permute.xlu1 %133  ;;  %v129_v30 = vpop.permute.xlu0 %128 }
  0x8c   :  { %v124_v33 = vpop.permute.xlu1 %123  ;;  %v119_v35 = vpop.permute.xlu0 %118 }
  0x90   :  { %v114_v44 = vpop.permute.xlu1 %113  ;;  %v109_v48 = vpop.permute.xlu0 %108 }
  0x94   :  { %v104_v53 = vpop.permute.xlu1 %103  ;;  %v99_v57 = vpop.permute.xlu0 %98 }
  0x98   :  { %v94_v62 = vpop.permute.xlu1 %93  ;;  %v89_v0 = vpop.permute.xlu0 %88 }
  0x9c   :  { %v84_v6 = vpop.permute.xlu1 %83  ;;  %v79_v10 = vpop.permute.xlu0 %78 }
  0xca   :  { %v1336_v14 = vpop.f32.mrf.mxu0 }
  0xcb   :  { %v270_v5 = vadd.f32 %v1336_v14, %v89_v0  ;;  %v1482_v14 = vld [vmem:[%s1969_s3 + $0x8] sm:$0xff]  }
  0xcc   :  { %v1826_v15 = vpop.f32.mrf.mxu0 }
  0xcd   :  { %v262_v11 = vadd.f32 %v1826_v15, %v79_v10  ;;  %v1484_v15 = vld [vmem:[%s1969_s3 + $0x18] sm:$0xff]  }
  0xce   :  { %v1337_v16 = vpop.f32.mrf.mxu0 }
  0xcf   :  { %v273_v1 = vadd.f32 %v1337_v16, %v94_v62 }
  0xd0   :  { %v1828_v17 = vpop.f32.mrf.mxu0 }
  0xd1   :  { %v325_v7 = vpack.c.bf16 %v273_v1, %v270_v5  ;;  %v265_v8 = vadd.f32 %v1828_v17, %v84_v6  ;;  %v1483_v17 = vld [vmem:[%s1969_s3 + $0x10] sm:$0xff]  }
  0xd2   :  { %v1340_v19 = vpop.f32.mrf.mxu0 }
  0xd3   :  { %v286_v58 = vadd.f32 %v1340_v19, %v109_v48  ;;  %v324_v12 = vpack.c.bf16 %v265_v8, %v262_v11  ;;  %v333_v13 = vmax.bf16 %v1527_v3, %v325_v7  ;;  %v1486_v19 = vld [vmem:[%s1969_s3 + $0x28] sm:$0xff]  }
  0xd4   :  { %v277_v21 = vpop.f32.mrf.mxu0 }
  0xd5   :  { %v278_v63 = vadd.f32 %v277_v21, %v99_v57  ;;  %v332_v16 = vmax.bf16 %v1527_v3, %v324_v12  ;;  %v1488_v21 = vld [vmem:[%s1969_s3 + $0x38] sm:$0xff]  }
  0xd6   :  { %v1341_v22 = vpop.f32.mrf.mxu0 }
  0xd7   :  { %v289_v54 = vadd.f32 %v1341_v22, %v114_v44  ;;  %v1489_v22 = vld [vmem:[%s1971_s5] sm:$0xff]  }
  0xd8   :  { %v280_v24 = vpop.f32.mrf.mxu0  ;;  %1398 = vmatprep.mubr.bf16.mxu0 %v1489_v22 }
  0xd9   :  { %v327_v59 = vpack.c.bf16 %v289_v54, %v286_v58  ;;  %v281_v60 = vadd.f32 %v280_v24, %v104_v53 }
  0xda   :  { %v1344_v26 = vpop.f32.mrf.mxu0 }
  0xdb   :  { %v302_v45 = vadd.f32 %v1344_v26, %v129_v30  ;;  %v326_v2 = vpack.c.bf16 %v281_v60, %v278_v63  ;;  %v335_v4 = vmax.bf16 %v1527_v3, %v327_v59 }
  0xdc   :  { %v293_v27 = vpop.f32.mrf.mxu0 }
  0xdd   :  { %v294_v52 = vadd.f32 %v293_v27, %v119_v35  ;;  %v334_v9 = vmax.bf16 %v1527_v3, %v326_v2  ;;  %v450_v27 = vpop.permute.xlu1 %449 }
  0xde   :  { %v1345_v29 = vpop.f32.mrf.mxu0 }
  0xdf   :  { %v305_v40 = vadd.f32 %v1345_v29, %v134_v28  ;;  %v445_v29 = vpop.permute.xlu0 %444 }
  0xe0   :  { %v296_v31 = vpop.f32.mrf.mxu0 }
  0xe1   :  { %v329_v49 = vpack.c.bf16 %v305_v40, %v302_v45  ;;  %v297_v50 = vadd.f32 %v296_v31, %v124_v33 }
  0xe2   :  { %v1348_v32 = vpop.f32.mrf.mxu0 }
  0xe3   :  { %v318_v37 = vadd.f32 %v1348_v32, %v149_v20  ;;  %v328_v55 = vpack.c.bf16 %v297_v50, %v294_v52  ;;  %v337_v56 = vmax.bf16 %v1527_v3, %v329_v49  ;;  %v1487_v20 = vld [vmem:[%s1969_s3 + $0x30] sm:$0xff]   ;;  %v440_v32 = vpop.permute.xlu1 %439 }
  0xe4   :  { %v309_v34 = vpop.f32.mrf.mxu0 }
  0xe5   :  { %v310_v41 = vadd.f32 %v309_v34, %v139_v18  ;;  %v336_v61 = vmax.bf16 %v1527_v3, %v328_v55  ;;  %v1485_v18 = vld [vmem:[%s1969_s3 + $0x20] sm:$0xff]   ;;  %v435_v34 = vpop.permute.xlu0 %434 }
  0xe6   :  { %v1349_v36 = vpop.f32.mrf.mxu0 }
  0xe7   :  { %v321_v38 = vadd.f32 %v1349_v36, %v154_v25 }
  0xe8   :  { %v312_v39 = vpop.f32.mrf.mxu0 }
  0xe9   :  { %v331_v42 = vpack.c.bf16 %v321_v38, %v318_v37  ;;  %v313_v43 = vadd.f32 %v312_v39, %v144_v23  ;;  %v430_v37 = vpop.permute.xlu1 %429  ;;  %v425_v39 = vpop.permute.xlu0 %424 }
  0xeb   :  { %v330_v46 = vpack.c.bf16 %v313_v43, %v310_v41  ;;  %v339_v47 = vmax.bf16 %v1527_v3, %v331_v42 }
  0xed   :  { %1350 = vmatprep.subr.bf16.mxu1 %v339_v47  ;;  %v338_v51 = vmax.bf16 %v1527_v3, %v330_v46  ;;  %v420_v42 = vpop.permute.xlu1 %419  ;;  %v415_v44 = vpop.permute.xlu0 %414 }
  0xee   :  { %1351 = vmatpush3.bf16.msra.mxu1 %v339_v47 }
  0xef   :  { %1352 = vmatprep.subr.bf16.mxu1 %v338_v51 }
  0xf1   :  { %v410_v53 = vpop.permute.xlu1 %409  ;;  %v405_v57 = vpop.permute.xlu0 %404 }
  0xf2   :  { %1353 = vmatpush3.bf16.msra.mxu1 %v338_v51 }
  0xf3   :  { %1354 = vmatprep.subr.bf16.mxu1 %v337_v56 }
  0xf5   :  { %v400_v62 = vpop.permute.xlu1 %399  ;;  %v395_v2 = vpop.permute.xlu0 %394 }
  0xf6   :  { %1355 = vmatpush3.bf16.msra.mxu1 %v337_v56 }
  0xf7   :  { %1356 = vmatprep.subr.bf16.mxu1 %v336_v61 }
  0xf9   :  { %v390_v8 = vpop.permute.xlu1 %389  ;;  %v385_v10 = vpop.permute.xlu0 %384 }
  0xfa   :  { %1357 = vmatpush3.bf16.msra.mxu1 %v336_v61 }
  0xfb   :  { %1358 = vmatprep.subr.bf16.mxu1 %v335_v4 }
  0xfe   :  { %1359 = vmatpush3.bf16.msra.mxu1 %v335_v4 }
  0xff   :  { %1360 = vmatprep.subr.bf16.mxu1 %v334_v9 }
 0x102   :  { %1361 = vmatpush3.bf16.msra.mxu1 %v334_v9 }
 0x103   :  { %1362 = vmatprep.subr.bf16.mxu1 %v333_v13 }
 0x106   :  { %1363 = vmatpush3.bf16.msra.mxu1 %v333_v13 }
 0x107   :  { %1364 = vmatprep.subr.bf16.mxu1 %v332_v16 }
 0x10a   :  { %1365 = vmatpush3.bf16.msra.mxu1 %v332_v16 }
 0x10d   :  { %1367 = vmatmul.mubr.bf16.vlgmr.msra.gmra.mxu1 %v1482_v14  ;;  %v380_v14 = vpop.permute.xlu1 %379 }
 0x10e   :  { %1370 = vmatprep.mubr.bf16.mxu1 %v1483_v17 }
 0x115   :  { %1371 = vmatmul.mubr.bf16.gmra.mxu1 %v1484_v15 }
 0x116   :  { %1374 = vmatprep.mubr.bf16.mxu1 %v1485_v18 }
 0x11d   :  { %1375 = vmatmul.mubr.bf16.gmra.mxu1 %v1486_v19  ;;  %v375_v19 = vpop.permute.xlu0 %374 }
 0x11e   :  { %1378 = vmatprep.mubr.bf16.mxu1 %v1487_v20 }
 0x125   :  { %1379 = vmatmul.mubr.bf16.gmra.mxu1 %v1488_v21 }
 0x1cd   :  { %v1368_v23 = vpop.f32.mrf.mxu1 }
 0x1ce   :  { %v543_v16 = vadd.f32 %v1368_v23, %v385_v10  ;;  %v1490_v23 = vld [vmem:[%s1971_s5 + $0x8] sm:$0xff]  }
 0x1cf   :  { %v1864_v24 = vpop.f32.mrf.mxu1 }
 0x1d0   :  { %v535_v20 = vadd.f32 %v1864_v24, %v375_v19  ;;  %v1492_v24 = vld [vmem:[%s1971_s5 + $0x18] sm:$0xff]  }
 0x1d1   :  { %v1369_v25 = vpop.f32.mrf.mxu1 }
 0x1d2   :  { %v546_v11 = vadd.f32 %v1369_v25, %v390_v8 }
 0x1d3   :  { %v1866_v26 = vpop.f32.mrf.mxu1 }
 0x1d4   :  { %v598_v17 = vpack.c.bf16 %v546_v11, %v543_v16  ;;  %v538_v15 = vadd.f32 %v1866_v26, %v380_v14  ;;  %v1491_v26 = vld [vmem:[%s1971_s5 + $0x10] sm:$0xff]  }
 0x1d5   :  { %v1372_v28 = vpop.f32.mrf.mxu1 }
 0x1d6   :  { %v559_v4 = vadd.f32 %v1372_v28, %v405_v57  ;;  %v597_v21 = vpack.c.bf16 %v538_v15, %v535_v20  ;;  %v606_v22 = vmax.bf16 %v1527_v3, %v598_v17  ;;  %v1494_v28 = vld [vmem:[%s1971_s5 + $0x28] sm:$0xff]  }
 0x1d7   :  { %v550_v30 = vpop.f32.mrf.mxu1 }
 0x1d8   :  { %v551_v9 = vadd.f32 %v550_v30, %v395_v2  ;;  %v605_v25 = vmax.bf16 %v1527_v3, %v597_v21  ;;  %v1496_v30 = vld [vmem:[%s1971_s5 + $0x38] sm:$0xff]  }
 0x1d9   :  { %v1373_v31 = vpop.f32.mrf.mxu1 }
 0x1da   :  { %v562_v63 = vadd.f32 %v1373_v31, %v410_v53  ;;  %v1497_v31 = vld [vmem:[%s1973_s7] sm:$0xff]  }
 0x1db   :  { %v553_v33 = vpop.f32.mrf.mxu1  ;;  %1430 = vmatprep.mubr.bf16.mxu1 %v1497_v31 }
 0x1dc   :  { %v600_v5 = vpack.c.bf16 %v562_v63, %v559_v4  ;;  %v554_v6 = vadd.f32 %v553_v33, %v400_v62 }
 0x1dd   :  { %v1376_v35 = vpop.f32.mrf.mxu1 }
 0x1de   :  { %v575_v54 = vadd.f32 %v1376_v35, %v425_v39  ;;  %v599_v12 = vpack.c.bf16 %v554_v6, %v551_v9  ;;  %v608_v13 = vmax.bf16 %v1527_v3, %v600_v5 }
 0x1df   :  { %v566_v36 = vpop.f32.mrf.mxu1 }
 0x1e0   :  { %v567_v61 = vadd.f32 %v566_v36, %v415_v44  ;;  %v607_v18 = vmax.bf16 %v1527_v3, %v599_v12  ;;  %v723_v36 = vpop.permute.xlu1 %722 }
 0x1e1   :  { %v1377_v38 = vpop.f32.mrf.mxu1 }
 0x1e2   :  { %v578_v49 = vadd.f32 %v1377_v38, %v430_v37  ;;  %v718_v38 = vpop.permute.xlu0 %717 }
 0x1e3   :  { %v569_v40 = vpop.f32.mrf.mxu1 }
 0x1e4   :  { %v602_v58 = vpack.c.bf16 %v578_v49, %v575_v54  ;;  %v570_v59 = vadd.f32 %v569_v40, %v420_v42 }
 0x1e5   :  { %v1380_v41 = vpop.f32.mrf.mxu1 }
 0x1e6   :  { %v591_v46 = vadd.f32 %v1380_v41, %v445_v29  ;;  %v601_v0 = vpack.c.bf16 %v570_v59, %v567_v61  ;;  %v610_v1 = vmax.bf16 %v1527_v3, %v602_v58  ;;  %v1495_v29 = vld [vmem:[%s1971_s5 + $0x30] sm:$0xff]   ;;  %v713_v41 = vpop.permute.xlu1 %712 }
 0x1e7   :  { %v582_v43 = vpop.f32.mrf.mxu1 }
 0x1e8   :  { %v583_v50 = vadd.f32 %v582_v43, %v435_v34  ;;  %v609_v7 = vmax.bf16 %v1527_v3, %v601_v0  ;;  %v708_v43 = vpop.permute.xlu0 %707 }
 0x1e9   :  { %v1381_v45 = vpop.f32.mrf.mxu1 }
 0x1ea   :  { %v594_v47 = vadd.f32 %v1381_v45, %v450_v27  ;;  %v1493_v27 = vld [vmem:[%s1971_s5 + $0x20] sm:$0xff]  }
 0x1eb   :  { %v585_v48 = vpop.f32.mrf.mxu1 }
 0x1ec   :  { %v604_v51 = vpack.c.bf16 %v594_v47, %v591_v46  ;;  %v586_v52 = vadd.f32 %v585_v48, %v440_v32  ;;  %v703_v46 = vpop.permute.xlu1 %702  ;;  %v698_v48 = vpop.permute.xlu0 %697 }
 0x1ee   :  { %v603_v55 = vpack.c.bf16 %v586_v52, %v583_v50  ;;  %v612_v56 = vmax.bf16 %v1527_v3, %v604_v51 }
 0x1f0   :  { %1382 = vmatprep.subr.bf16.mxu0 %v612_v56  ;;  %v611_v60 = vmax.bf16 %v1527_v3, %v603_v55  ;;  %v693_v51 = vpop.permute.xlu1 %692  ;;  %v688_v53 = vpop.permute.xlu0 %687 }
 0x1f1   :  { %1383 = vmatpush3.bf16.msra.mxu0 %v612_v56 }
 0x1f2   :  { %1384 = vmatprep.subr.bf16.mxu0 %v611_v60 }
 0x1f4   :  { %v683_v62 = vpop.permute.xlu1 %682  ;;  %v678_v2 = vpop.permute.xlu0 %677 }
 0x1f5   :  { %1385 = vmatpush3.bf16.msra.mxu0 %v611_v60 }
 0x1f6   :  { %1386 = vmatprep.subr.bf16.mxu0 %v610_v1 }
 0x1f8   :  { %v673_v8 = vpop.permute.xlu1 %672  ;;  %v668_v12 = vpop.permute.xlu0 %667 }
 0x1f9   :  { %1387 = vmatpush3.bf16.msra.mxu0 %v610_v1 }
 0x1fa   :  { %1388 = vmatprep.subr.bf16.mxu0 %v609_v7 }
 0x1fc   :  { %v663_v15 = vpop.permute.xlu1 %662  ;;  %v658_v19 = vpop.permute.xlu0 %657 }
 0x1fd   :  { %1389 = vmatpush3.bf16.msra.mxu0 %v609_v7 }
 0x1fe   :  { %1390 = vmatprep.subr.bf16.mxu0 %v608_v13 }
 0x201   :  { %1391 = vmatpush3.bf16.msra.mxu0 %v608_v13 }
 0x202   :  { %1392 = vmatprep.subr.bf16.mxu0 %v607_v18 }
 0x205   :  { %1393 = vmatpush3.bf16.msra.mxu0 %v607_v18 }
 0x206   :  { %1394 = vmatprep.subr.bf16.mxu0 %v606_v22 }
 0x209   :  { %1395 = vmatpush3.bf16.msra.mxu0 %v606_v22 }
 0x20a   :  { %1396 = vmatprep.subr.bf16.mxu0 %v605_v25 }
 0x20d   :  { %1397 = vmatpush3.bf16.msra.mxu0 %v605_v25 }
 0x210   :  { %1399 = vmatmul.mubr.bf16.vlgmr.msra.gmra.mxu0 %v1490_v23  ;;  %v653_v23 = vpop.permute.xlu1 %652 }
 0x211   :  { %1402 = vmatprep.mubr.bf16.mxu0 %v1491_v26 }
 0x218   :  { %1403 = vmatmul.mubr.bf16.gmra.mxu0 %v1492_v24 }
 0x219   :  { %1406 = vmatprep.mubr.bf16.mxu0 %v1493_v27 }
 0x220   :  { %1407 = vmatmul.mubr.bf16.gmra.mxu0 %v1494_v28  ;;  %v648_v28 = vpop.permute.xlu0 %647 }
 0x221   :  { %1410 = vmatprep.mubr.bf16.mxu0 %v1495_v29 }
 0x228   :  { %1411 = vmatmul.mubr.bf16.gmra.mxu0 %v1496_v30 }
 0x2d0   :  { %v1400_v32 = vpop.f32.mrf.mxu0 }
 0x2d1   :  { %v816_v25 = vadd.f32 %v1400_v32, %v658_v19  ;;  %v1498_v32 = vld [vmem:[%s1973_s7 + $0x8] sm:$0xff]  }
 0x2d2   :  { %v1902_v33 = vpop.f32.mrf.mxu0 }
 0x2d3   :  { %v808_v29 = vadd.f32 %v1902_v33, %v648_v28  ;;  %v1500_v33 = vld [vmem:[%s1973_s7 + $0x18] sm:$0xff]  }
 0x2d4   :  { %v1401_v34 = vpop.f32.mrf.mxu0 }
 0x2d5   :  { %v819_v20 = vadd.f32 %v1401_v34, %v663_v15 }
 0x2d6   :  { %v1904_v35 = vpop.f32.mrf.mxu0 }
 0x2d7   :  { %v871_v26 = vpack.c.bf16 %v819_v20, %v816_v25  ;;  %v811_v24 = vadd.f32 %v1904_v35, %v653_v23  ;;  %v1499_v35 = vld [vmem:[%s1973_s7 + $0x10] sm:$0xff]  }
 0x2d8   :  { %v1404_v37 = vpop.f32.mrf.mxu0 }
 0x2d9   :  { %v832_v13 = vadd.f32 %v1404_v37, %v678_v2  ;;  %v870_v30 = vpack.c.bf16 %v811_v24, %v808_v29  ;;  %v879_v31 = vmax.bf16 %v1527_v3, %v871_v26  ;;  %v1502_v37 = vld [vmem:[%s1973_s7 + $0x28] sm:$0xff]  }
 0x2da   :  { %v823_v39 = vpop.f32.mrf.mxu0 }
 0x2db   :  { %v824_v18 = vadd.f32 %v823_v39, %v668_v12  ;;  %v878_v34 = vmax.bf16 %v1527_v3, %v870_v30  ;;  %v1504_v39 = vld [vmem:[%s1973_s7 + $0x38] sm:$0xff]  }
 0x2dc   :  { %v1405_v40 = vpop.f32.mrf.mxu0 }
 0x2dd   :  { %v835_v9 = vadd.f32 %v1405_v40, %v683_v62  ;;  %v1528_v40 = vmov 0.0  }
 0x2de   :  { %v826_v42 = vpop.f32.mrf.mxu0  ;;  %1446 = vmatprep.subr.bf16.mxu0 %v1528_v40  ;;  %1462 = vmatprep.mubr.msk.bf16.mxu0 %vm1529_vm1, %v1528_v40 }
 0x2df   :  { %v873_v16 = vpack.c.bf16 %v835_v9, %v832_v13  ;;  %v827_v14 = vadd.f32 %v826_v42, %v673_v8 }
 0x2e0   :  { %v1408_v44 = vpop.f32.mrf.mxu0 }
 0x2e1   :  { %v848_v63 = vadd.f32 %v1408_v44, %v698_v48  ;;  %v872_v21 = vpack.c.bf16 %v827_v14, %v824_v18  ;;  %v881_v22 = vmax.bf16 %v1527_v3, %v873_v16  ;;  %v991_v48 = vpop.permute.xlu0 %990 }
 0x2e2   :  { %v839_v45 = vpop.f32.mrf.mxu0 }
 0x2e3   :  { %v840_v7 = vadd.f32 %v839_v45, %v688_v53  ;;  %v880_v27 = vmax.bf16 %v1527_v3, %v872_v21 }
 0x2e4   :  { %v1409_v47 = vpop.f32.mrf.mxu0 }
 0x2e5   :  { %v851_v58 = vadd.f32 %v1409_v47, %v703_v46  ;;  %v996_v46 = vpop.permute.xlu1 %995  ;;  %v981_v53 = vpop.permute.xlu0 %980 }
 0x2e6   :  { %v842_v49 = vpop.f32.mrf.mxu0 }
 0x2e7   :  { %v875_v4 = vpack.c.bf16 %v851_v58, %v848_v63  ;;  %v843_v5 = vadd.f32 %v842_v49, %v693_v51 }
 0x2e8   :  { %v1412_v50 = vpop.f32.mrf.mxu0 }
 0x2e9   :  { %v864_v55 = vadd.f32 %v1412_v50, %v718_v38  ;;  %v874_v10 = vpack.c.bf16 %v843_v5, %v840_v7  ;;  %v883_v11 = vmax.bf16 %v1527_v3, %v875_v4  ;;  %v1503_v38 = vld [vmem:[%s1973_s7 + $0x30] sm:$0xff]   ;;  %v986_v51 = vpop.permute.xlu1 %985  ;;  %v971_v58 = vpop.permute.xlu0 %970 }
 0x2ea   :  { %v855_v52 = vpop.f32.mrf.mxu0 }
 0x2eb   :  { %v856_v59 = vadd.f32 %v855_v52, %v708_v43  ;;  %v882_v17 = vmax.bf16 %v1527_v3, %v874_v10 }
 0x2ec   :  { %v1413_v54 = vpop.f32.mrf.mxu0 }
 0x2ed   :  { %v867_v56 = vadd.f32 %v1413_v54, %v723_v36  ;;  %v1501_v36 = vld [vmem:[%s1973_s7 + $0x20] sm:$0xff]  }
 0x2ee   :  { %v858_v57 = vpop.f32.mrf.mxu0 }
 0x2ef   :  { %v877_v60 = vpack.c.bf16 %v867_v56, %v864_v55  ;;  %v859_v61 = vadd.f32 %v858_v57, %v713_v41  ;;  %v976_v56 = vpop.permute.xlu1 %975 }
 0x2f1   :  { %v876_v0 = vpack.c.bf16 %v859_v61, %v856_v59  ;;  %v885_v1 = vmax.bf16 %v1527_v3, %v877_v60 }
 0x2f3   :  { %1414 = vmatprep.subr.bf16.mxu1 %v885_v1  ;;  %v884_v6 = vmax.bf16 %v1527_v3, %v876_v0  ;;  %v966_v61 = vpop.permute.xlu1 %965 }
 0x2f4   :  { %1415 = vmatpush3.bf16.msra.mxu1 %v885_v1  ;;  %v961_v1 = vpop.permute.xlu0 %960 }
 0x2f5   :  { %1416 = vmatprep.subr.bf16.mxu1 %v884_v6 }
 0x2f7   :  { %v956_v10 = vpop.permute.xlu1 %955 }
 0x2f8   :  { %1417 = vmatpush3.bf16.msra.mxu1 %v884_v6  ;;  %v951_v12 = vpop.permute.xlu0 %950 }
 0x2f9   :  { %1418 = vmatprep.subr.bf16.mxu1 %v883_v11 }
 0x2fb   :  { %v946_v15 = vpop.permute.xlu1 %945 }
 0x2fc   :  { %1419 = vmatpush3.bf16.msra.mxu1 %v883_v11  ;;  %v941_v21 = vpop.permute.xlu0 %940 }
 0x2fd   :  { %1420 = vmatprep.subr.bf16.mxu1 %v882_v17 }
 0x2ff   :  { %v936_v24 = vpop.permute.xlu1 %935 }
 0x300   :  { %1421 = vmatpush3.bf16.msra.mxu1 %v882_v17  ;;  %v931_v28 = vpop.permute.xlu0 %930 }
 0x301   :  { %1422 = vmatprep.subr.bf16.mxu1 %v881_v22 }
 0x304   :  { %1423 = vmatpush3.bf16.msra.mxu1 %v881_v22 }
 0x305   :  { %1424 = vmatprep.subr.bf16.mxu1 %v880_v27 }
 0x308   :  { %1425 = vmatpush3.bf16.msra.mxu1 %v880_v27 }
 0x309   :  { %1426 = vmatprep.subr.bf16.mxu1 %v879_v31 }
 0x30c   :  { %1427 = vmatpush3.bf16.msra.mxu1 %v879_v31 }
 0x30d   :  { %1428 = vmatprep.subr.bf16.mxu1 %v878_v34 }
 0x310   :  { %1429 = vmatpush3.bf16.msra.mxu1 %v878_v34 }
 0x313   :  { %1431 = vmatmul.mubr.bf16.vlgmr.msra.gmra.mxu1 %v1498_v32  ;;  %v926_v32 = vpop.permute.xlu1 %925 }
 0x314   :  { %1434 = vmatprep.mubr.bf16.mxu1 %v1499_v35 }
 0x31b   :  { %1435 = vmatmul.mubr.bf16.gmra.mxu1 %v1500_v33 }
 0x31c   :  { %1438 = vmatprep.mubr.bf16.mxu1 %v1501_v36 }
 0x323   :  { %1439 = vmatmul.mubr.bf16.gmra.mxu1 %v1502_v37  ;;  %v921_v37 = vpop.permute.xlu0 %920 }
 0x324   :  { %1442 = vmatprep.mubr.bf16.mxu1 %v1503_v38 }
 0x32b   :  { %1443 = vmatmul.mubr.bf16.gmra.mxu1 %v1504_v39 }
 0x3d3   :  { %v1432_v41 = vpop.f32.mrf.mxu1 }
 0x3d4   :  { %v1089_v34 = vadd.f32 %v1432_v41, %v931_v28 }
 0x3d5   :  { %v1939_v42 = vpop.f32.mrf.mxu1 }
 0x3d6   :  { %v1081_v38 = vadd.f32 %v1939_v42, %v921_v37 }
 0x3d7   :  { %v1433_v43 = vpop.f32.mrf.mxu1 }
 0x3d8   :  { %v1092_v29 = vadd.f32 %v1433_v43, %v936_v24 }
 0x3d9   :  { %v1941_v44 = vpop.f32.mrf.mxu1 }
 0x3da   :  { %v1144_v35 = vpack.c.bf16 %v1092_v29, %v1089_v34  ;;  %v1084_v33 = vadd.f32 %v1941_v44, %v926_v32  ;;  %v1159_v44 = vld [vmem:[%s1975_s9] sm:$0x1] }
 0x3db   :  { %v1436_v45 = vpop.f32.mrf.mxu1 }
 0x3dc   :  { %v1105_v22 = vadd.f32 %v1436_v45, %v951_v12  ;;  %v1152_v39 = vmax.bf16 %v1527_v3, %v1144_v35  ;;  %v1143_v43 = vpack.c.bf16 %v1084_v33, %v1081_v38  ;;  %v1166_v45 = vlaneseq }
 0x3dd   :  { %v1096_v47 = vpop.f32.mrf.mxu1 }
 0x3de   :  { %v1097_v27 = vadd.f32 %v1096_v47, %v941_v21  ;;  %v1151_v41 = vmax.bf16 %v1527_v3, %v1143_v43  ;;  %v1164_v47 = vpop.permute.xlu0 %1163 }
 0x3df   :  { %v1437_v49 = vpop.f32.mrf.mxu1 }
 0x3e0   :  { %v1108_v18 = vadd.f32 %v1437_v49, %v956_v10 }
 0x3e1   :  { %v1099_v50 = vpop.f32.mrf.mxu1 }
 0x3e2   :  { %v1146_v25 = vpack.c.bf16 %v1108_v18, %v1105_v22  ;;  %v1100_v23 = vadd.f32 %v1099_v50, %v946_v15 }
 0x3e3   :  { %v1440_v52 = vpop.f32.mrf.mxu1 }
 0x3e4   :  { %v1121_v11 = vadd.f32 %v1440_v52, %v971_v58  ;;  %v1154_v30 = vmax.bf16 %v1527_v3, %v1146_v25  ;;  %v1145_v31 = vpack.c.bf16 %v1100_v23, %v1097_v27 }
 0x3e5   :  { %v1112_v54 = vpop.f32.mrf.mxu1 }
 0x3e6   :  { %v1113_v17 = vadd.f32 %v1112_v54, %v961_v1  ;;  %v1153_v36 = vmax.bf16 %v1527_v3, %v1145_v31 }
 0x3e7   :  { %v1441_v55 = vpop.f32.mrf.mxu1 }
 0x3e8   :  { %v1124_v7 = vadd.f32 %v1441_v55, %v976_v56 }
 0x3e9   :  { %v1115_v57 = vpop.f32.mrf.mxu1 }
 0x3ea   :  { %v1148_v13 = vpack.c.bf16 %v1124_v7, %v1121_v11  ;;  %v1116_v16 = vadd.f32 %v1115_v57, %v966_v61 }
 0x3eb   :  { %v1444_v59 = vpop.f32.mrf.mxu1 }
 0x3ec   :  { %v1137_v63 = vadd.f32 %v1444_v59, %v991_v48  ;;  %v1156_v19 = vmax.bf16 %v1527_v3, %v1148_v13  ;;  %v1147_v20 = vpack.c.bf16 %v1116_v16, %v1113_v17 }
 0x3ed   :  { %v1128_v60 = vpop.f32.mrf.mxu1 }
 0x3ee   :  { %v1129_v4 = vadd.f32 %v1128_v60, %v981_v53  ;;  %v1155_v26 = vmax.bf16 %v1527_v3, %v1147_v20 }
 0x3ef   :  { %v1445_v62 = vpop.f32.mrf.mxu1 }
 0x3f0   :  { %v1140_v0 = vadd.f32 %v1445_v62, %v996_v46  ;;  %v1167_v46 = vshrl.u32 %v1166_v45, 7 }
 0x3f1   :  { %v1131_v2 = vpop.f32.mrf.mxu1 }
 0x3f2   :  { %v1150_v5 = vpack.c.bf16 %v1140_v0, %v1137_v63  ;;  %v1132_v6 = vadd.f32 %v1131_v2, %v986_v51  ;;  %v1168_v42 = vsub.s32 0, %v1167_v46 }
 0x3f4   :  { %v1158_v8 = vmax.bf16 %v1527_v3, %v1150_v5  ;;  %v1149_v9 = vpack.c.bf16 %v1132_v6, %v1129_v4  ;;  %v1169_v48 = vrot.slane %v1164_v47, %v1168_v42 }
 0x3f6   :  { %1447 = vmatpush3.bf16.msra.mxu0 %v1158_v8  ;;  %v1157_v14 = vmax.bf16 %v1527_v3, %v1149_v9 }
 0x3f7   :  { %1448 = vmatprep.subr.bf16.mxu0 %v1528_v40 }
 0x3fa   :  { %1449 = vmatpush3.bf16.msra.mxu0 %v1157_v14 }
 0x3fb   :  { %1450 = vmatprep.subr.bf16.mxu0 %v1528_v40 }
 0x3fe   :  { %1451 = vmatpush3.bf16.msra.mxu0 %v1156_v19 }
 0x3ff   :  { %1452 = vmatprep.subr.bf16.mxu0 %v1528_v40 }
 0x402   :  { %1453 = vmatpush3.bf16.msra.mxu0 %v1155_v26 }
 0x403   :  { %1454 = vmatprep.subr.bf16.mxu0 %v1528_v40 }
 0x406   :  { %1455 = vmatpush3.bf16.msra.mxu0 %v1154_v30 }
 0x407   :  { %1456 = vmatprep.subr.bf16.mxu0 %v1528_v40 }
 0x40a   :  { %1457 = vmatpush3.bf16.msra.mxu0 %v1153_v36 }
 0x40b   :  { %1458 = vmatprep.subr.bf16.mxu0 %v1528_v40 }
 0x40e   :  { %1459 = vmatpush3.bf16.msra.mxu0 %v1152_v39 }
 0x40f   :  { %1460 = vmatprep.subr.bf16.mxu0 %v1528_v40 }
 0x412   :  { %1461 = vmatpush3.bf16.msra.mxu0 %v1151_v41 }
 0x415   :  { %1463 = vmatmul.mubr.bf16.vlgmr.msra.gmra.mxu0 %v1159_v44 }
 0x4d5   :  { %v1204_v49 = vpop.f32.mrf.mxu0 }
 0x4d6   :  { %v1205_v50 = vadd.f32 %v1204_v49, %v1169_v48 }
 0x4d7   :  { %v1464_v51 = vpop.f32.mrf.mxu0 }
 0x4d8   :  { %1210 = vst [vmem:[#allocation3] sm:$0x1] %v1205_v50 }
 0x4d9   :  { %v1207_v40 = vpop.f32.mrf.mxu0 }
 0x4da   :  { %1516 = shalt.err (!%p1513_p4)
}
 0x4db   :  { %1220 = dma.vmem_to_hbm [thread:$0]  %s1218_s22, 16, %s1977_s11, [#allocation4]   ;;  %v1465_v3 = vpop.f32.mrf.mxu0 }
 0x4dc   :  { %1525 = dma.done.wait [#allocation4], 16  }
 0x4dd   :  { %1526 = vsyncadd [#allocation4], 4294967280 }
 0x4de   :  { %1224 = vsyncpa [#allocation4], 1 }

// kernel: tpu_custom_call.1
= control target key start
LH: loop header
LB: loop body
LE: loop exit
PB: predicated region body
PF: predicated region fallthrough
CT: control target
= control target key end

     0   :  { %s1966_s0 = inlined_call_operand.vmem [shape: bf16[16,128], index: 0, kind: input, shape index: {}]   ;;  %s1967_s1 = inlined_call_operand.vmem [shape: bf16[128,16], index: 1, kind: input, shape index: {}]   ;;  %s1968_s2 = inlined_call_operand.vmem [shape: f32[128,1], index: 2, kind: input, shape index: {}]   ;;  %s1969_s3 = inlined_call_operand.vmem [shape: bf16[128,128], index: 3, kind: input, shape index: {}]   ;;  %s1970_s4 = inlined_call_operand.vmem [shape: f32[128,1], index: 4, kind: input, shape index: {}]   ;;  %s1971_s5 = inlined_call_operand.vmem [shape: bf16[128,128], index: 5, kind: input, shape index: {}]   ;;  %s1972_s6 = inlined_call_operand.vmem [shape: f32[128,1], index: 6, kind: input, shape index: {}]   ;;  %s1973_s7 = inlined_call_operand.vmem [shape: bf16[128,128], index: 7, kind: input, shape index: {}]   ;;  %s1974_s8 = inlined_call_operand.vmem [shape: f32[128,1], index: 8, kind: input, shape index: {}]   ;;  %s1975_s9 = inlined_call_operand.vmem [shape: bf16[1,128], index: 9, kind: input, shape index: {}]   ;;  %s1976_s10 = inlined_call_operand.<no memory space> [shape: f32[1,1], index: 10, kind: input, shape index: {}]   ;;  %s1977_s11 = inlined_call_operand.hbm [shape: f32[1,128], index: 11, kind: output, shape index: {}]  }
   0x1   :  { %v16_v0 = vstv %s1976_s10 }
   0x2   :  { %17 = vst [vmem:[#allocation2] sm:$0x1] %v16_v0 }
   0x3   :  { %v74_v1 = vld [vmem:[%s1968_s2 + $0x70] sm:$0xff]  ;;  %v72_v2 = vld [vmem:[%s1968_s2 + $0x60] sm:$0xff]  ;;  %v1527_v3 = vmov 0   ;;  %v75_v5 = vld [vmem:[%s1968_s2 + $0x78] sm:$0xff]  ;;  %vm202_vm0 = vcmask 130048  }
   0x4   :  { %1471 = vset.pattern.permute.xlu1 %v1527_v3  ;;  %1470 = vset.pattern.permute.xlu0 %v1527_v3  ;;  %v1472_v4 = vld [vmem:[%s1966_s0] sm:$0xff]   ;;  %v73_v6 = vld [vmem:[%s1968_s2 + $0x68] sm:$0xff]  ;;  %v1475_v9 = vld [vmem:[%s1967_s1 + $0x10] sm:$0xff]  }
   0x5   :  { %148 = vperm.xlu0 %1470, %v74_v1   ;;  %138 = vperm.xlu1 %1471, %v72_v2   ;;  %v1473_v7 = vld [vmem:[%s1967_s1] sm:$0xff]   ;;  %v1474_v8 = vld [vmem:[%s1967_s1 + $0x8] sm:$0xff]   ;;  %v71_v10 = vld [vmem:[%s1968_s2 + $0x58] sm:$0xff] }
   0x6   :  { %1332 = vmatprep.subr.bf16.mxu0 %v1472_v4  ;;  %1334 = vmatprep.mubr.msk.bf16.mxu0 %vm202_vm0, %v1473_v7  ;;  %v70_v11 = vld [vmem:[%s1968_s2 + $0x50] sm:$0xff]  ;;  %v69_v12 = vld [vmem:[%s1968_s2 + $0x48] sm:$0xff]  ;;  %v68_v13 = vld [vmem:[%s1968_s2 + $0x40] sm:$0xff] }
   0x7   :  { %1333 = vmatpush3.bf16.msra.mxu0 %v1472_v4  ;;  %v1476_v14 = vld [vmem:[%s1967_s1 + $0x18] sm:$0xff]   ;;  %v1477_v15 = vld [vmem:[%s1967_s1 + $0x20] sm:$0xff]   ;;  %v66_v17 = vld [vmem:[%s1968_s2 + $0x30] sm:$0xff] }
   0x8   :  { %v67_v16 = vld [vmem:[%s1968_s2 + $0x38] sm:$0xff]  ;;  %v65_v18 = vld [vmem:[%s1968_s2 + $0x28] sm:$0xff]  ;;  %v64_v19 = vld [vmem:[%s1968_s2 + $0x20] sm:$0xff] }
   0x9   :  { %153 = vperm.xlu0 %1470, %v75_v5   ;;  %143 = vperm.xlu1 %1471, %v73_v6   ;;  %v1478_v20 = vld [vmem:[%s1967_s1 + $0x28] sm:$0xff]   ;;  %v1479_v21 = vld [vmem:[%s1967_s1 + $0x30] sm:$0xff]   ;;  %v63_v22 = vld [vmem:[%s1968_s2 + $0x18] sm:$0xff] }
   0xa   :  { %1335 = vmatmul.mubr.msk.bf16.vlgmr.msra.gmra.mxu0 %vm202_vm0, %v1474_v8  ;;  %v62_v23 = vld [vmem:[%s1968_s2 + $0x10] sm:$0xff]  ;;  %v61_v24 = vld [vmem:[%s1968_s2 + $0x8] sm:$0xff]  ;;  %v60_v25 = vld [vmem:[%s1968_s2] sm:$0xff] }
   0xb   :  { %1338 = vmatprep.mubr.msk.bf16.mxu0 %vm202_vm0, %v1475_v9  ;;  %v1480_v26 = vld [vmem:[%s1967_s1 + $0x38] sm:$0xff]   ;;  %v370_v28 = vld [vmem:[%s1970_s4 + $0x70] sm:$0xff]  ;;  %v369_v29 = vld [vmem:[%s1970_s4 + $0x68] sm:$0xff] }
   0xc   :  { %v371_v27 = vld [vmem:[%s1970_s4 + $0x78] sm:$0xff]  ;;  %v368_v30 = vld [vmem:[%s1970_s4 + $0x60] sm:$0xff]  ;;  %v366_v32 = vld [vmem:[%s1970_s4 + $0x50] sm:$0xff] }
   0xd   :  { %133 = vperm.xlu1 %1471, %v71_v10   ;;  %128 = vperm.xlu0 %1470, %v70_v11   ;;  %v367_v31 = vld [vmem:[%s1970_s4 + $0x58] sm:$0xff]  ;;  %v365_v33 = vld [vmem:[%s1970_s4 + $0x48] sm:$0xff]  ;;  %v364_v34 = vld [vmem:[%s1970_s4 + $0x40] sm:$0xff] }
  0x11   :  { %123 = vperm.xlu1 %1471, %v69_v12   ;;  %118 = vperm.xlu0 %1470, %v68_v13  }
  0x12   :  { %1339 = vmatmul.mubr.msk.bf16.gmra.mxu0 %vm202_vm0, %v1476_v14 }
  0x13   :  { %1342 = vmatprep.mubr.msk.bf16.mxu0 %vm202_vm0, %v1477_v15 }
  0x15   :  { %113 = vperm.xlu1 %1471, %v67_v16   ;;  %108 = vperm.xlu0 %1470, %v66_v17  }
  0x19   :  { %103 = vperm.xlu1 %1471, %v65_v18   ;;  %98 = vperm.xlu0 %1470, %v64_v19  }
  0x1a   :  { %1343 = vmatmul.mubr.msk.bf16.gmra.mxu0 %vm202_vm0, %v1478_v20 }
  0x1b   :  { %1346 = vmatprep.mubr.msk.bf16.mxu0 %vm202_vm0, %v1479_v21 }
  0x1d   :  { %93 = vperm.xlu1 %1471, %v63_v22   ;;  %88 = vperm.xlu0 %1470, %v62_v23  }
  0x21   :  { %83 = vperm.xlu1 %1471, %v61_v24   ;;  %78 = vperm.xlu0 %1470, %v60_v25  }
  0x22   :  { %1347 = vmatmul.mubr.msk.bf16.gmra.mxu0 %vm202_vm0, %v1480_v26 }
  0x25   :  { %449 = vperm.xlu1 %1471, %v371_v27   ;;  %444 = vperm.xlu0 %1470, %v370_v28  }
  0x29   :  { %439 = vperm.xlu1 %1471, %v369_v29   ;;  %434 = vperm.xlu0 %1470, %v368_v30  }
  0x2d   :  { %429 = vperm.xlu1 %1471, %v367_v31   ;;  %424 = vperm.xlu0 %1470, %v366_v32  }
  0x31   :  { %419 = vperm.xlu1 %1471, %v365_v33   ;;  %414 = vperm.xlu0 %1470, %v364_v34  }
  0x32   :  { %18 = vsyncpa [#allocation4], 0  ;;  %v363_v35 = vld [vmem:[%s1970_s4 + $0x38] sm:$0xff]  ;;  %v362_v36 = vld [vmem:[%s1970_s4 + $0x30] sm:$0xff]  ;;  %vm1529_vm1 = vmmov 0   ;;  %s1530_s21 = smov [#allocation3]  }
  0x33   :  { %v361_v37 = vld [vmem:[%s1970_s4 + $0x28] sm:$0xff]  ;;  %v360_v38 = vld [vmem:[%s1970_s4 + $0x20] sm:$0xff]  ;;  %v359_v39 = vld [vmem:[%s1970_s4 + $0x18] sm:$0xff]  ;;  %s1217_s22 = sshll.u32 %s1530_s21, 4  ;;  %s1218_s22 = int_to_ptr.vmem [resolvable:$true] %s1217_s22 }
  0x34   :  { %v358_v40 = vld [vmem:[%s1970_s4 + $0x10] sm:$0xff]  ;;  %v357_v41 = vld [vmem:[%s1970_s4 + $0x8] sm:$0xff]  ;;  %v356_v42 = vld [vmem:[%s1970_s4] sm:$0xff]  ;;  %s1505_s23 = scalar_lea.vmem %s1218_s22, 16  ;;  %s1509_s24 = scalar_lea.vmem %s1218_s22, 32 }
  0x35   :  { %409 = vperm.xlu1 %1471, %v363_v35   ;;  %404 = vperm.xlu0 %1470, %v362_v36   ;;  %v644_v43 = vld [vmem:[%s1972_s6 + $0x78] sm:$0xff]  ;;  %v643_v44 = vld [vmem:[%s1972_s6 + $0x70] sm:$0xff]  ;;  %v642_v45 = vld [vmem:[%s1972_s6 + $0x68] sm:$0xff]  ;;  %p1506_p0 = scmp.ne.s32.totalorder %s1218_s22, %s1505_s23  ;;  %p1510_p1 = scmp.lt.s32.totalorder %s1218_s22, %s1218_s22 }
  0x36   :  { %v641_v46 = vld [vmem:[%s1972_s6 + $0x60] sm:$0xff]  ;;  %v640_v47 = vld [vmem:[%s1972_s6 + $0x58] sm:$0xff]  ;;  %v639_v48 = vld [vmem:[%s1972_s6 + $0x50] sm:$0xff]  ;;  %p1511_p2 = scmp.lt.s32.totalorder %s1509_s24, %s1505_s23 }
  0x37   :  { %v638_v49 = vld [vmem:[%s1972_s6 + $0x48] sm:$0xff]  ;;  %v637_v50 = vld [vmem:[%s1972_s6 + $0x40] sm:$0xff]  ;;  %v636_v51 = vld [vmem:[%s1972_s6 + $0x38] sm:$0xff] }
  0x38   :  { %v635_v52 = vld [vmem:[%s1972_s6 + $0x30] sm:$0xff]  ;;  %v634_v53 = vld [vmem:[%s1972_s6 + $0x28] sm:$0xff]  ;;  %v633_v54 = vld [vmem:[%s1972_s6 + $0x20] sm:$0xff]  ;;  %p1512_p3 = por %p1511_p2, %p1510_p1 }
  0x39   :  { %399 = vperm.xlu1 %1471, %v361_v37   ;;  %394 = vperm.xlu0 %1470, %v360_v38   ;;  %v632_v55 = vld [vmem:[%s1972_s6 + $0x18] sm:$0xff]  ;;  %v631_v56 = vld [vmem:[%s1972_s6 + $0x10] sm:$0xff]  ;;  %v630_v57 = vld [vmem:[%s1972_s6 + $0x8] sm:$0xff] }
  0x3a   :  { %v629_v58 = vld [vmem:[%s1972_s6] sm:$0xff]  ;;  %v917_v59 = vld [vmem:[%s1974_s8 + $0x78] sm:$0xff]  ;;  %v916_v60 = vld [vmem:[%s1974_s8 + $0x70] sm:$0xff]  ;;  %p1513_p4 = pnand %p1512_p3, %p1506_p0 }
  0x3b   :  { %v915_v61 = vld [vmem:[%s1974_s8 + $0x68] sm:$0xff]  ;;  %v914_v62 = vld [vmem:[%s1974_s8 + $0x60] sm:$0xff]  ;;  %v913_v63 = vld [vmem:[%s1974_s8 + $0x58] sm:$0xff] }
  0x3c   :  { %v912_v0 = vld [vmem:[%s1974_s8 + $0x50] sm:$0xff]  ;;  %v911_v1 = vld [vmem:[%s1974_s8 + $0x48] sm:$0xff]  ;;  %v910_v2 = vld [vmem:[%s1974_s8 + $0x40] sm:$0xff] }
  0x3d   :  { %389 = vperm.xlu1 %1471, %v359_v39   ;;  %384 = vperm.xlu0 %1470, %v358_v40   ;;  %v909_v4 = vld [vmem:[%s1974_s8 + $0x38] sm:$0xff]  ;;  %v908_v5 = vld [vmem:[%s1974_s8 + $0x30] sm:$0xff]  ;;  %v907_v6 = vld [vmem:[%s1974_s8 + $0x28] sm:$0xff] }
  0x3e   :  { %v906_v7 = vld [vmem:[%s1974_s8 + $0x20] sm:$0xff]  ;;  %v905_v8 = vld [vmem:[%s1974_s8 + $0x18] sm:$0xff]  ;;  %v904_v9 = vld [vmem:[%s1974_s8 + $0x10] sm:$0xff] }
  0x3f   :  { %v903_v10 = vld [vmem:[%s1974_s8 + $0x8] sm:$0xff]  ;;  %v902_v11 = vld [vmem:[%s1974_s8] sm:$0xff] }
  0x40   :  { %v1160_v12 = vld [vmem:[#allocation2] sm:$0x1] }
  0x41   :  { %379 = vperm.xlu1 %1471, %v357_v41   ;;  %374 = vperm.xlu0 %1470, %v356_v42   ;;  %v1481_v13 = vld [vmem:[%s1969_s3] sm:$0xff]  }
  0x42   :  { %1366 = vmatprep.mubr.bf16.mxu1 %v1481_v13 }
  0x45   :  { %722 = vperm.xlu1 %1471, %v644_v43   ;;  %717 = vperm.xlu0 %1470, %v643_v44  }
  0x49   :  { %712 = vperm.xlu1 %1471, %v642_v45   ;;  %707 = vperm.xlu0 %1470, %v641_v46  }
  0x4d   :  { %702 = vperm.xlu1 %1471, %v640_v47   ;;  %697 = vperm.xlu0 %1470, %v639_v48  }
  0x51   :  { %692 = vperm.xlu1 %1471, %v638_v49   ;;  %687 = vperm.xlu0 %1470, %v637_v50  }
  0x55   :  { %682 = vperm.xlu1 %1471, %v636_v51   ;;  %677 = vperm.xlu0 %1470, %v635_v52  }
  0x59   :  { %672 = vperm.xlu1 %1471, %v634_v53   ;;  %667 = vperm.xlu0 %1470, %v633_v54  }
  0x5d   :  { %662 = vperm.xlu1 %1471, %v632_v55   ;;  %657 = vperm.xlu0 %1470, %v631_v56  }
  0x61   :  { %652 = vperm.xlu1 %1471, %v630_v57   ;;  %647 = vperm.xlu0 %1470, %v629_v58  }
  0x65   :  { %995 = vperm.xlu1 %1471, %v917_v59   ;;  %990 = vperm.xlu0 %1470, %v916_v60  }
  0x69   :  { %985 = vperm.xlu1 %1471, %v915_v61   ;;  %980 = vperm.xlu0 %1470, %v914_v62  }
  0x6d   :  { %975 = vperm.xlu1 %1471, %v913_v63   ;;  %970 = vperm.xlu0 %1470, %v912_v0  }
  0x71   :  { %965 = vperm.xlu1 %1471, %v911_v1   ;;  %960 = vperm.xlu0 %1470, %v910_v2  }
  0x75   :  { %955 = vperm.xlu1 %1471, %v909_v4   ;;  %950 = vperm.xlu0 %1470, %v908_v5  }
  0x79   :  { %945 = vperm.xlu1 %1471, %v907_v6   ;;  %940 = vperm.xlu0 %1470, %v906_v7  }
  0x7d   :  { %935 = vperm.xlu1 %1471, %v905_v8   ;;  %930 = vperm.xlu0 %1470, %v904_v9  }
  0x80   :  { %v139_v18 = vpop.permute.xlu1 %138  ;;  %v149_v20 = vpop.permute.xlu0 %148 }
  0x81   :  { %925 = vperm.xlu1 %1471, %v903_v10   ;;  %920 = vperm.xlu0 %1470, %v902_v11  }
  0x84   :  { %v144_v23 = vpop.permute.xlu1 %143  ;;  %v154_v25 = vpop.permute.xlu0 %153 }
  0x85   :  { %1163 = vperm.xlu0 %1470, %v1160_v12  }
  0x88   :  { %v134_v28 = vpop.permute.xlu1 %133  ;;  %v129_v30 = vpop.permute.xlu0 %128 }
  0x8c   :  { %v124_v33 = vpop.permute.xlu1 %123  ;;  %v119_v35 = vpop.permute.xlu0 %118 }
  0x90   :  { %v114_v44 = vpop.permute.xlu1 %113  ;;  %v109_v48 = vpop.permute.xlu0 %108 }
  0x94   :  { %v104_v53 = vpop.permute.xlu1 %103  ;;  %v99_v57 = vpop.permute.xlu0 %98 }
  0x98   :  { %v94_v62 = vpop.permute.xlu1 %93  ;;  %v89_v0 = vpop.permute.xlu0 %88 }
  0x9c   :  { %v84_v6 = vpop.permute.xlu1 %83  ;;  %v79_v10 = vpop.permute.xlu0 %78 }
  0xca   :  { %v1336_v14 = vpop.f32.mrf.mxu0 }
  0xcb   :  { %v270_v5 = vadd.f32 %v1336_v14, %v89_v0  ;;  %v1482_v14 = vld [vmem:[%s1969_s3 + $0x8] sm:$0xff]  }
  0xcc   :  { %v1826_v15 = vpop.f32.mrf.mxu0 }
  0xcd   :  { %v262_v11 = vadd.f32 %v1826_v15, %v79_v10  ;;  %v1484_v15 = vld [vmem:[%s1969_s3 + $0x18] sm:$0xff]  }
  0xce   :  { %v1337_v16 = vpop.f32.mrf.mxu0 }
  0xcf   :  { %v273_v1 = vadd.f32 %v1337_v16, %v94_v62 }
  0xd0   :  { %v1828_v17 = vpop.f32.mrf.mxu0 }
  0xd1   :  { %v325_v7 = vpack.c.bf16 %v273_v1, %v270_v5  ;;  %v265_v8 = vadd.f32 %v1828_v17, %v84_v6  ;;  %v1483_v17 = vld [vmem:[%s1969_s3 + $0x10] sm:$0xff]  }
  0xd2   :  { %v1340_v19 = vpop.f32.mrf.mxu0 }
  0xd3   :  { %v286_v58 = vadd.f32 %v1340_v19, %v109_v48  ;;  %v324_v12 = vpack.c.bf16 %v265_v8, %v262_v11  ;;  %v333_v13 = vmax.bf16 %v1527_v3, %v325_v7  ;;  %v1486_v19 = vld [vmem:[%s1969_s3 + $0x28] sm:$0xff]  }
  0xd4   :  { %v277_v21 = vpop.f32.mrf.mxu0 }
  0xd5   :  { %v278_v63 = vadd.f32 %v277_v21, %v99_v57  ;;  %v332_v16 = vmax.bf16 %v1527_v3, %v324_v12  ;;  %v1488_v21 = vld [vmem:[%s1969_s3 + $0x38] sm:$0xff]  }
  0xd6   :  { %v1341_v22 = vpop.f32.mrf.mxu0 }
  0xd7   :  { %v289_v54 = vadd.f32 %v1341_v22, %v114_v44  ;;  %v1489_v22 = vld [vmem:[%s1971_s5] sm:$0xff]  }
  0xd8   :  { %v280_v24 = vpop.f32.mrf.mxu0  ;;  %1398 = vmatprep.mubr.bf16.mxu0 %v1489_v22 }
  0xd9   :  { %v327_v59 = vpack.c.bf16 %v289_v54, %v286_v58  ;;  %v281_v60 = vadd.f32 %v280_v24, %v104_v53 }
  0xda   :  { %v1344_v26 = vpop.f32.mrf.mxu0 }
  0xdb   :  { %v302_v45 = vadd.f32 %v1344_v26, %v129_v30  ;;  %v326_v2 = vpack.c.bf16 %v281_v60, %v278_v63  ;;  %v335_v4 = vmax.bf16 %v1527_v3, %v327_v59 }
  0xdc   :  { %v293_v27 = vpop.f32.mrf.mxu0 }
  0xdd   :  { %v294_v52 = vadd.f32 %v293_v27, %v119_v35  ;;  %v334_v9 = vmax.bf16 %v1527_v3, %v326_v2  ;;  %v450_v27 = vpop.permute.xlu1 %449 }
  0xde   :  { %v1345_v29 = vpop.f32.mrf.mxu0 }
  0xdf   :  { %v305_v40 = vadd.f32 %v1345_v29, %v134_v28  ;;  %v445_v29 = vpop.permute.xlu0 %444 }
  0xe0   :  { %v296_v31 = vpop.f32.mrf.mxu0 }
  0xe1   :  { %v329_v49 = vpack.c.bf16 %v305_v40, %v302_v45  ;;  %v297_v50 = vadd.f32 %v296_v31, %v124_v33 }
  0xe2   :  { %v1348_v32 = vpop.f32.mrf.mxu0 }
  0xe3   :  { %v318_v37 = vadd.f32 %v1348_v32, %v149_v20  ;;  %v328_v55 = vpack.c.bf16 %v297_v50, %v294_v52  ;;  %v337_v56 = vmax.bf16 %v1527_v3, %v329_v49  ;;  %v1487_v20 = vld [vmem:[%s1969_s3 + $0x30] sm:$0xff]   ;;  %v440_v32 = vpop.permute.xlu1 %439 }
  0xe4   :  { %v309_v34 = vpop.f32.mrf.mxu0 }
  0xe5   :  { %v310_v41 = vadd.f32 %v309_v34, %v139_v18  ;;  %v336_v61 = vmax.bf16 %v1527_v3, %v328_v55  ;;  %v1485_v18 = vld [vmem:[%s1969_s3 + $0x20] sm:$0xff]   ;;  %v435_v34 = vpop.permute.xlu0 %434 }
  0xe6   :  { %v1349_v36 = vpop.f32.mrf.mxu0 }
  0xe7   :  { %v321_v38 = vadd.f32 %v1349_v36, %v154_v25 }
  0xe8   :  { %v312_v39 = vpop.f32.mrf.mxu0 }
  0xe9   :  { %v331_v42 = vpack.c.bf16 %v321_v38, %v318_v37  ;;  %v313_v43 = vadd.f32 %v312_v39, %v144_v23  ;;  %v430_v37 = vpop.permute.xlu1 %429  ;;  %v425_v39 = vpop.permute.xlu0 %424 }
  0xeb   :  { %v330_v46 = vpack.c.bf16 %v313_v43, %v310_v41  ;;  %v339_v47 = vmax.bf16 %v1527_v3, %v331_v42 }
  0xed   :  { %1350 = vmatprep.subr.bf16.mxu1 %v339_v47  ;;  %v338_v51 = vmax.bf16 %v1527_v3, %v330_v46  ;;  %v420_v42 = vpop.permute.xlu1 %419  ;;  %v415_v44 = vpop.permute.xlu0 %414 }
  0xee   :  { %1351 = vmatpush3.bf16.msra.mxu1 %v339_v47 }
  0xef   :  { %1352 = vmatprep.subr.bf16.mxu1 %v338_v51 }
  0xf1   :  { %v410_v53 = vpop.permute.xlu1 %409  ;;  %v405_v57 = vpop.permute.xlu0 %404 }
  0xf2   :  { %1353 = vmatpush3.bf16.msra.mxu1 %v338_v51 }
  0xf3   :  { %1354 = vmatprep.subr.bf16.mxu1 %v337_v56 }
  0xf5   :  { %v400_v62 = vpop.permute.xlu1 %399  ;;  %v395_v2 = vpop.permute.xlu0 %394 }
  0xf6   :  { %1355 = vmatpush3.bf16.msra.mxu1 %v337_v56 }
  0xf7   :  { %1356 = vmatprep.subr.bf16.mxu1 %v336_v61 }
  0xf9   :  { %v390_v8 = vpop.permute.xlu1 %389  ;;  %v385_v10 = vpop.permute.xlu0 %384 }
  0xfa   :  { %1357 = vmatpush3.bf16.msra.mxu1 %v336_v61 }
  0xfb   :  { %1358 = vmatprep.subr.bf16.mxu1 %v335_v4 }
  0xfe   :  { %1359 = vmatpush3.bf16.msra.mxu1 %v335_v4 }
  0xff   :  { %1360 = vmatprep.subr.bf16.mxu1 %v334_v9 }
 0x102   :  { %1361 = vmatpush3.bf16.msra.mxu1 %v334_v9 }
 0x103   :  { %1362 = vmatprep.subr.bf16.mxu1 %v333_v13 }
 0x106   :  { %1363 = vmatpush3.bf16.msra.mxu1 %v333_v13 }
 0x107   :  { %1364 = vmatprep.subr.bf16.mxu1 %v332_v16 }
 0x10a   :  { %1365 = vmatpush3.bf16.msra.mxu1 %v332_v16 }
 0x10d   :  { %1367 = vmatmul.mubr.bf16.vlgmr.msra.gmra.mxu1 %v1482_v14  ;;  %v380_v14 = vpop.permute.xlu1 %379 }
 0x10e   :  { %1370 = vmatprep.mubr.bf16.mxu1 %v1483_v17 }
 0x115   :  { %1371 = vmatmul.mubr.bf16.gmra.mxu1 %v1484_v15 }
 0x116   :  { %1374 = vmatprep.mubr.bf16.mxu1 %v1485_v18 }
 0x11d   :  { %1375 = vmatmul.mubr.bf16.gmra.mxu1 %v1486_v19  ;;  %v375_v19 = vpop.permute.xlu0 %374 }
 0x11e   :  { %1378 = vmatprep.mubr.bf16.mxu1 %v1487_v20 }
 0x125   :  { %1379 = vmatmul.mubr.bf16.gmra.mxu1 %v1488_v21 }
 0x1cd   :  { %v1368_v23 = vpop.f32.mrf.mxu1 }
 0x1ce   :  { %v543_v16 = vadd.f32 %v1368_v23, %v385_v10  ;;  %v1490_v23 = vld [vmem:[%s1971_s5 + $0x8] sm:$0xff]  }
 0x1cf   :  { %v1864_v24 = vpop.f32.mrf.mxu1 }
 0x1d0   :  { %v535_v20 = vadd.f32 %v1864_v24, %v375_v19  ;;  %v1492_v24 = vld [vmem:[%s1971_s5 + $0x18] sm:$0xff]  }
 0x1d1   :  { %v1369_v25 = vpop.f32.mrf.mxu1 }
 0x1d2   :  { %v546_v11 = vadd.f32 %v1369_v25, %v390_v8 }
 0x1d3   :  { %v1866_v26 = vpop.f32.mrf.mxu1 }
 0x1d4   :  { %v598_v17 = vpack.c.bf16 %v546_v11, %v543_v16  ;;  %v538_v15 = vadd.f32 %v1866_v26, %v380_v14  ;;  %v1491_v26 = vld [vmem:[%s1971_s5 + $0x10] sm:$0xff]  }
 0x1d5   :  { %v1372_v28 = vpop.f32.mrf.mxu1 }
 0x1d6   :  { %v559_v4 = vadd.f32 %v1372_v28, %v405_v57  ;;  %v597_v21 = vpack.c.bf16 %v538_v15, %v535_v20  ;;  %v606_v22 = vmax.bf16 %v1527_v3, %v598_v17  ;;  %v1494_v28 = vld [vmem:[%s1971_s5 + $0x28] sm:$0xff]  }
 0x1d7   :  { %v550_v30 = vpop.f32.mrf.mxu1 }
 0x1d8   :  { %v551_v9 = vadd.f32 %v550_v30, %v395_v2  ;;  %v605_v25 = vmax.bf16 %v1527_v3, %v597_v21  ;;  %v1496_v30 = vld [vmem:[%s1971_s5 + $0x38] sm:$0xff]  }
 0x1d9   :  { %v1373_v31 = vpop.f32.mrf.mxu1 }
 0x1da   :  { %v562_v63 = vadd.f32 %v1373_v31, %v410_v53  ;;  %v1497_v31 = vld [vmem:[%s1973_s7] sm:$0xff]  }
 0x1db   :  { %v553_v33 = vpop.f32.mrf.mxu1  ;;  %1430 = vmatprep.mubr.bf16.mxu1 %v1497_v31 }
 0x1dc   :  { %v600_v5 = vpack.c.bf16 %v562_v63, %v559_v4  ;;  %v554_v6 = vadd.f32 %v553_v33, %v400_v62 }
 0x1dd   :  { %v1376_v35 = vpop.f32.mrf.mxu1 }
 0x1de   :  { %v575_v54 = vadd.f32 %v1376_v35, %v425_v39  ;;  %v599_v12 = vpack.c.bf16 %v554_v6, %v551_v9  ;;  %v608_v13 = vmax.bf16 %v1527_v3, %v600_v5 }
 0x1df   :  { %v566_v36 = vpop.f32.mrf.mxu1 }
 0x1e0   :  { %v567_v61 = vadd.f32 %v566_v36, %v415_v44  ;;  %v607_v18 = vmax.bf16 %v1527_v3, %v599_v12  ;;  %v723_v36 = vpop.permute.xlu1 %722 }
 0x1e1   :  { %v1377_v38 = vpop.f32.mrf.mxu1 }
 0x1e2   :  { %v578_v49 = vadd.f32 %v1377_v38, %v430_v37  ;;  %v718_v38 = vpop.permute.xlu0 %717 }
 0x1e3   :  { %v569_v40 = vpop.f32.mrf.mxu1 }
 0x1e4   :  { %v602_v58 = vpack.c.bf16 %v578_v49, %v575_v54  ;;  %v570_v59 = vadd.f32 %v569_v40, %v420_v42 }
 0x1e5   :  { %v1380_v41 = vpop.f32.mrf.mxu1 }
 0x1e6   :  { %v591_v46 = vadd.f32 %v1380_v41, %v445_v29  ;;  %v601_v0 = vpack.c.bf16 %v570_v59, %v567_v61  ;;  %v610_v1 = vmax.bf16 %v1527_v3, %v602_v58  ;;  %v1495_v29 = vld [vmem:[%s1971_s5 + $0x30] sm:$0xff]   ;;  %v713_v41 = vpop.permute.xlu1 %712 }
 0x1e7   :  { %v582_v43 = vpop.f32.mrf.mxu1 }
 0x1e8   :  { %v583_v50 = vadd.f32 %v582_v43, %v435_v34  ;;  %v609_v7 = vmax.bf16 %v1527_v3, %v601_v0  ;;  %v708_v43 = vpop.permute.xlu0 %707 }
 0x1e9   :  { %v1381_v45 = vpop.f32.mrf.mxu1 }
 0x1ea   :  { %v594_v47 = vadd.f32 %v1381_v45, %v450_v27  ;;  %v1493_v27 = vld [vmem:[%s1971_s5 + $0x20] sm:$0xff]  }
 0x1eb   :  { %v585_v48 = vpop.f32.mrf.mxu1 }
 0x1ec   :  { %v604_v51 = vpack.c.bf16 %v594_v47, %v591_v46  ;;  %v586_v52 = vadd.f32 %v585_v48, %v440_v32  ;;  %v703_v46 = vpop.permute.xlu1 %702  ;;  %v698_v48 = vpop.permute.xlu0 %697 }
 0x1ee   :  { %v603_v55 = vpack.c.bf16 %v586_v52, %v583_v50  ;;  %v612_v56 = vmax.bf16 %v1527_v3, %v604_v51 }
 0x1f0   :  { %1382 = vmatprep.subr.bf16.mxu0 %v612_v56  ;;  %v611_v60 = vmax.bf16 %v1527_v3, %v603_v55  ;;  %v693_v51 = vpop.permute.xlu1 %692  ;;  %v688_v53 = vpop.permute.xlu0 %687 }
 0x1f1   :  { %1383 = vmatpush3.bf16.msra.mxu0 %v612_v56 }
 0x1f2   :  { %1384 = vmatprep.subr.bf16.mxu0 %v611_v60 }
 0x1f4   :  { %v683_v62 = vpop.permute.xlu1 %682  ;;  %v678_v2 = vpop.permute.xlu0 %677 }
 0x1f5   :  { %1385 = vmatpush3.bf16.msra.mxu0 %v611_v60 }
 0x1f6   :  { %1386 = vmatprep.subr.bf16.mxu0 %v610_v1 }
 0x1f8   :  { %v673_v8 = vpop.permute.xlu1 %672  ;;  %v668_v12 = vpop.permute.xlu0 %667 }
 0x1f9   :  { %1387 = vmatpush3.bf16.msra.mxu0 %v610_v1 }
 0x1fa   :  { %1388 = vmatprep.subr.bf16.mxu0 %v609_v7 }
 0x1fc   :  { %v663_v15 = vpop.permute.xlu1 %662  ;;  %v658_v19 = vpop.permute.xlu0 %657 }
 0x1fd   :  { %1389 = vmatpush3.bf16.msra.mxu0 %v609_v7 }
 0x1fe   :  { %1390 = vmatprep.subr.bf16.mxu0 %v608_v13 }
 0x201   :  { %1391 = vmatpush3.bf16.msra.mxu0 %v608_v13 }
 0x202   :  { %1392 = vmatprep.subr.bf16.mxu0 %v607_v18 }
 0x205   :  { %1393 = vmatpush3.bf16.msra.mxu0 %v607_v18 }
 0x206   :  { %1394 = vmatprep.subr.bf16.mxu0 %v606_v22 }
 0x209   :  { %1395 = vmatpush3.bf16.msra.mxu0 %v606_v22 }
 0x20a   :  { %1396 = vmatprep.subr.bf16.mxu0 %v605_v25 }
 0x20d   :  { %1397 = vmatpush3.bf16.msra.mxu0 %v605_v25 }
 0x210   :  { %1399 = vmatmul.mubr.bf16.vlgmr.msra.gmra.mxu0 %v1490_v23  ;;  %v653_v23 = vpop.permute.xlu1 %652 }
 0x211   :  { %1402 = vmatprep.mubr.bf16.mxu0 %v1491_v26 }
 0x218   :  { %1403 = vmatmul.mubr.bf16.gmra.mxu0 %v1492_v24 }
 0x219   :  { %1406 = vmatprep.mubr.bf16.mxu0 %v1493_v27 }
 0x220   :  { %1407 = vmatmul.mubr.bf16.gmra.mxu0 %v1494_v28  ;;  %v648_v28 = vpop.permute.xlu0 %647 }
 0x221   :  { %1410 = vmatprep.mubr.bf16.mxu0 %v1495_v29 }
 0x228   :  { %1411 = vmatmul.mubr.bf16.gmra.mxu0 %v1496_v30 }
 0x2d0   :  { %v1400_v32 = vpop.f32.mrf.mxu0 }
 0x2d1   :  { %v816_v25 = vadd.f32 %v1400_v32, %v658_v19  ;;  %v1498_v32 = vld [vmem:[%s1973_s7 + $0x8] sm:$0xff]  }
 0x2d2   :  { %v1902_v33 = vpop.f32.mrf.mxu0 }
 0x2d3   :  { %v808_v29 = vadd.f32 %v1902_v33, %v648_v28  ;;  %v1500_v33 = vld [vmem:[%s1973_s7 + $0x18] sm:$0xff]  }
 0x2d4   :  { %v1401_v34 = vpop.f32.mrf.mxu0 }
 0x2d5   :  { %v819_v20 = vadd.f32 %v1401_v34, %v663_v15 }
 0x2d6   :  { %v1904_v35 = vpop.f32.mrf.mxu0 }
 0x2d7   :  { %v871_v26 = vpack.c.bf16 %v819_v20, %v816_v25  ;;  %v811_v24 = vadd.f32 %v1904_v35, %v653_v23  ;;  %v1499_v35 = vld [vmem:[%s1973_s7 + $0x10] sm:$0xff]  }
 0x2d8   :  { %v1404_v37 = vpop.f32.mrf.mxu0 }
 0x2d9   :  { %v832_v13 = vadd.f32 %v1404_v37, %v678_v2  ;;  %v870_v30 = vpack.c.bf16 %v811_v24, %v808_v29  ;;  %v879_v31 = vmax.bf16 %v1527_v3, %v871_v26  ;;  %v1502_v37 = vld [vmem:[%s1973_s7 + $0x28] sm:$0xff]  }
 0x2da   :  { %v823_v39 = vpop.f32.mrf.mxu0 }
 0x2db   :  { %v824_v18 = vadd.f32 %v823_v39, %v668_v12  ;;  %v878_v34 = vmax.bf16 %v1527_v3, %v870_v30  ;;  %v1504_v39 = vld [vmem:[%s1973_s7 + $0x38] sm:$0xff]  }
 0x2dc   :  { %v1405_v40 = vpop.f32.mrf.mxu0 }
 0x2dd   :  { %v835_v9 = vadd.f32 %v1405_v40, %v683_v62  ;;  %v1528_v40 = vmov 0.0  }
 0x2de   :  { %v826_v42 = vpop.f32.mrf.mxu0  ;;  %1446 = vmatprep.subr.bf16.mxu0 %v1528_v40  ;;  %1462 = vmatprep.mubr.msk.bf16.mxu0 %vm1529_vm1, %v1528_v40 }
 0x2df   :  { %v873_v16 = vpack.c.bf16 %v835_v9, %v832_v13  ;;  %v827_v14 = vadd.f32 %v826_v42, %v673_v8 }
 0x2e0   :  { %v1408_v44 = vpop.f32.mrf.mxu0 }
 0x2e1   :  { %v848_v63 = vadd.f32 %v1408_v44, %v698_v48  ;;  %v872_v21 = vpack.c.bf16 %v827_v14, %v824_v18  ;;  %v881_v22 = vmax.bf16 %v1527_v3, %v873_v16  ;;  %v991_v48 = vpop.permute.xlu0 %990 }
 0x2e2   :  { %v839_v45 = vpop.f32.mrf.mxu0 }
 0x2e3   :  { %v840_v7 = vadd.f32 %v839_v45, %v688_v53  ;;  %v880_v27 = vmax.bf16 %v1527_v3, %v872_v21 }
 0x2e4   :  { %v1409_v47 = vpop.f32.mrf.mxu0 }
 0x2e5   :  { %v851_v58 = vadd.f32 %v1409_v47, %v703_v46  ;;  %v996_v46 = vpop.permute.xlu1 %995  ;;  %v981_v53 = vpop.permute.xlu0 %980 }
 0x2e6   :  { %v842_v49 = vpop.f32.mrf.mxu0 }
 0x2e7   :  { %v875_v4 = vpack.c.bf16 %v851_v58, %v848_v63  ;;  %v843_v5 = vadd.f32 %v842_v49, %v693_v51 }
 0x2e8   :  { %v1412_v50 = vpop.f32.mrf.mxu0 }
 0x2e9   :  { %v864_v55 = vadd.f32 %v1412_v50, %v718_v38  ;;  %v874_v10 = vpack.c.bf16 %v843_v5, %v840_v7  ;;  %v883_v11 = vmax.bf16 %v1527_v3, %v875_v4  ;;  %v1503_v38 = vld [vmem:[%s1973_s7 + $0x30] sm:$0xff]   ;;  %v986_v51 = vpop.permute.xlu1 %985  ;;  %v971_v58 = vpop.permute.xlu0 %970 }
 0x2ea   :  { %v855_v52 = vpop.f32.mrf.mxu0 }
 0x2eb   :  { %v856_v59 = vadd.f32 %v855_v52, %v708_v43  ;;  %v882_v17 = vmax.bf16 %v1527_v3, %v874_v10 }
 0x2ec   :  { %v1413_v54 = vpop.f32.mrf.mxu0 }
 0x2ed   :  { %v867_v56 = vadd.f32 %v1413_v54, %v723_v36  ;;  %v1501_v36 = vld [vmem:[%s1973_s7 + $0x20] sm:$0xff]  }
 0x2ee   :  { %v858_v57 = vpop.f32.mrf.mxu0 }
 0x2ef   :  { %v877_v60 = vpack.c.bf16 %v867_v56, %v864_v55  ;;  %v859_v61 = vadd.f32 %v858_v57, %v713_v41  ;;  %v976_v56 = vpop.permute.xlu1 %975 }
 0x2f1   :  { %v876_v0 = vpack.c.bf16 %v859_v61, %v856_v59  ;;  %v885_v1 = vmax.bf16 %v1527_v3, %v877_v60 }
 0x2f3   :  { %1414 = vmatprep.subr.bf16.mxu1 %v885_v1  ;;  %v884_v6 = vmax.bf16 %v1527_v3, %v876_v0  ;;  %v966_v61 = vpop.permute.xlu1 %965 }
 0x2f4   :  { %1415 = vmatpush3.bf16.msra.mxu1 %v885_v1  ;;  %v961_v1 = vpop.permute.xlu0 %960 }
 0x2f5   :  { %1416 = vmatprep.subr.bf16.mxu1 %v884_v6 }
 0x2f7   :  { %v956_v10 = vpop.permute.xlu1 %955 }
 0x2f8   :  { %1417 = vmatpush3.bf16.msra.mxu1 %v884_v6  ;;  %v951_v12 = vpop.permute.xlu0 %950 }
 0x2f9   :  { %1418 = vmatprep.subr.bf16.mxu1 %v883_v11 }
 0x2fb   :  { %v946_v15 = vpop.permute.xlu1 %945 }
 0x2fc   :  { %1419 = vmatpush3.bf16.msra.mxu1 %v883_v11  ;;  %v941_v21 = vpop.permute.xlu0 %940 }
 0x2fd   :  { %1420 = vmatprep.subr.bf16.mxu1 %v882_v17 }
 0x2ff   :  { %v936_v24 = vpop.permute.xlu1 %935 }
 0x300   :  { %1421 = vmatpush3.bf16.msra.mxu1 %v882_v17  ;;  %v931_v28 = vpop.permute.xlu0 %930 }
 0x301   :  { %1422 = vmatprep.subr.bf16.mxu1 %v881_v22 }
 0x304   :  { %1423 = vmatpush3.bf16.msra.mxu1 %v881_v22 }
 0x305   :  { %1424 = vmatprep.subr.bf16.mxu1 %v880_v27 }
 0x308   :  { %1425 = vmatpush3.bf16.msra.mxu1 %v880_v27 }
 0x309   :  { %1426 = vmatprep.subr.bf16.mxu1 %v879_v31 }
 0x30c   :  { %1427 = vmatpush3.bf16.msra.mxu1 %v879_v31 }
 0x30d   :  { %1428 = vmatprep.subr.bf16.mxu1 %v878_v34 }
 0x310   :  { %1429 = vmatpush3.bf16.msra.mxu1 %v878_v34 }
 0x313   :  { %1431 = vmatmul.mubr.bf16.vlgmr.msra.gmra.mxu1 %v1498_v32  ;;  %v926_v32 = vpop.permute.xlu1 %925 }
 0x314   :  { %1434 = vmatprep.mubr.bf16.mxu1 %v1499_v35 }
 0x31b   :  { %1435 = vmatmul.mubr.bf16.gmra.mxu1 %v1500_v33 }
 0x31c   :  { %1438 = vmatprep.mubr.bf16.mxu1 %v1501_v36 }
 0x323   :  { %1439 = vmatmul.mubr.bf16.gmra.mxu1 %v1502_v37  ;;  %v921_v37 = vpop.permute.xlu0 %920 }
 0x324   :  { %1442 = vmatprep.mubr.bf16.mxu1 %v1503_v38 }
 0x32b   :  { %1443 = vmatmul.mubr.bf16.gmra.mxu1 %v1504_v39 }
 0x3d3   :  { %v1432_v41 = vpop.f32.mrf.mxu1 }
 0x3d4   :  { %v1089_v34 = vadd.f32 %v1432_v41, %v931_v28 }
 0x3d5   :  { %v1939_v42 = vpop.f32.mrf.mxu1 }
 0x3d6   :  { %v1081_v38 = vadd.f32 %v1939_v42, %v921_v37 }
 0x3d7   :  { %v1433_v43 = vpop.f32.mrf.mxu1 }
 0x3d8   :  { %v1092_v29 = vadd.f32 %v1433_v43, %v936_v24 }
 0x3d9   :  { %v1941_v44 = vpop.f32.mrf.mxu1 }
 0x3da   :  { %v1144_v35 = vpack.c.bf16 %v1092_v29, %v1089_v34  ;;  %v1084_v33 = vadd.f32 %v1941_v44, %v926_v32  ;;  %v1159_v44 = vld [vmem:[%s1975_s9] sm:$0x1] }
 0x3db   :  { %v1436_v45 = vpop.f32.mrf.mxu1 }
 0x3dc   :  { %v1105_v22 = vadd.f32 %v1436_v45, %v951_v12  ;;  %v1152_v39 = vmax.bf16 %v1527_v3, %v1144_v35  ;;  %v1143_v43 = vpack.c.bf16 %v1084_v33, %v1081_v38  ;;  %v1166_v45 = vlaneseq }
 0x3dd   :  { %v1096_v47 = vpop.f32.mrf.mxu1 }
 0x3de   :  { %v1097_v27 = vadd.f32 %v1096_v47, %v941_v21  ;;  %v1151_v41 = vmax.bf16 %v1527_v3, %v1143_v43  ;;  %v1164_v47 = vpop.permute.xlu0 %1163 }
 0x3df   :  { %v1437_v49 = vpop.f32.mrf.mxu1 }
 0x3e0   :  { %v1108_v18 = vadd.f32 %v1437_v49, %v956_v10 }
 0x3e1   :  { %v1099_v50 = vpop.f32.mrf.mxu1 }
 0x3e2   :  { %v1146_v25 = vpack.c.bf16 %v1108_v18, %v1105_v22  ;;  %v1100_v23 = vadd.f32 %v1099_v50, %v946_v15 }
 0x3e3   :  { %v1440_v52 = vpop.f32.mrf.mxu1 }
 0x3e4   :  { %v1121_v11 = vadd.f32 %v1440_v52, %v971_v58  ;;  %v1154_v30 = vmax.bf16 %v1527_v3, %v1146_v25  ;;  %v1145_v31 = vpack.c.bf16 %v1100_v23, %v1097_v27 }
 0x3e5   :  { %v1112_v54 = vpop.f32.mrf.mxu1 }
 0x3e6   :  { %v1113_v17 = vadd.f32 %v1112_v54, %v961_v1  ;;  %v1153_v36 = vmax.bf16 %v1527_v3, %v1145_v31 }
 0x3e7   :  { %v1441_v55 = vpop.f32.mrf.mxu1 }
 0x3e8   :  { %v1124_v7 = vadd.f32 %v1441_v55, %v976_v56 }
 0x3e9   :  { %v1115_v57 = vpop.f32.mrf.mxu1 }
 0x3ea   :  { %v1148_v13 = vpack.c.bf16 %v1124_v7, %v1121_v11  ;;  %v1116_v16 = vadd.f32 %v1115_v57, %v966_v61 }
 0x3eb   :  { %v1444_v59 = vpop.f32.mrf.mxu1 }
 0x3ec   :  { %v1137_v63 = vadd.f32 %v1444_v59, %v991_v48  ;;  %v1156_v19 = vmax.bf16 %v1527_v3, %v1148_v13  ;;  %v1147_v20 = vpack.c.bf16 %v1116_v16, %v1113_v17 }
 0x3ed   :  { %v1128_v60 = vpop.f32.mrf.mxu1 }
 0x3ee   :  { %v1129_v4 = vadd.f32 %v1128_v60, %v981_v53  ;;  %v1155_v26 = vmax.bf16 %v1527_v3, %v1147_v20 }
 0x3ef   :  { %v1445_v62 = vpop.f32.mrf.mxu1 }
 0x3f0   :  { %v1140_v0 = vadd.f32 %v1445_v62, %v996_v46  ;;  %v1167_v46 = vshrl.u32 %v1166_v45, 7 }
 0x3f1   :  { %v1131_v2 = vpop.f32.mrf.mxu1 }
 0x3f2   :  { %v1150_v5 = vpack.c.bf16 %v1140_v0, %v1137_v63  ;;  %v1132_v6 = vadd.f32 %v1131_v2, %v986_v51  ;;  %v1168_v42 = vsub.s32 0, %v1167_v46 }
 0x3f4   :  { %v1158_v8 = vmax.bf16 %v1527_v3, %v1150_v5  ;;  %v1149_v9 = vpack.c.bf16 %v1132_v6, %v1129_v4  ;;  %v1169_v48 = vrot.slane %v1164_v47, %v1168_v42 }
 0x3f6   :  { %1447 = vmatpush3.bf16.msra.mxu0 %v1158_v8  ;;  %v1157_v14 = vmax.bf16 %v1527_v3, %v1149_v9 }
 0x3f7   :  { %1448 = vmatprep.subr.bf16.mxu0 %v1528_v40 }
 0x3fa   :  { %1449 = vmatpush3.bf16.msra.mxu0 %v1157_v14 }
 0x3fb   :  { %1450 = vmatprep.subr.bf16.mxu0 %v1528_v40 }
 0x3fe   :  { %1451 = vmatpush3.bf16.msra.mxu0 %v1156_v19 }
 0x3ff   :  { %1452 = vmatprep.subr.bf16.mxu0 %v1528_v40 }
 0x402   :  { %1453 = vmatpush3.bf16.msra.mxu0 %v1155_v26 }
 0x403   :  { %1454 = vmatprep.subr.bf16.mxu0 %v1528_v40 }
 0x406   :  { %1455 = vmatpush3.bf16.msra.mxu0 %v1154_v30 }
 0x407   :  { %1456 = vmatprep.subr.bf16.mxu0 %v1528_v40 }
 0x40a   :  { %1457 = vmatpush3.bf16.msra.mxu0 %v1153_v36 }
 0x40b   :  { %1458 = vmatprep.subr.bf16.mxu0 %v1528_v40 }
 0x40e   :  { %1459 = vmatpush3.bf16.msra.mxu0 %v1152_v39 }
 0x40f   :  { %1460 = vmatprep.subr.bf16.mxu0 %v1528_v40 }
 0x412   :  { %1461 = vmatpush3.bf16.msra.mxu0 %v1151_v41 }
 0x415   :  { %1463 = vmatmul.mubr.bf16.vlgmr.msra.gmra.mxu0 %v1159_v44 }
 0x4d5   :  { %v1204_v49 = vpop.f32.mrf.mxu0 }
 0x4d6   :  { %v1205_v50 = vadd.f32 %v1204_v49, %v1169_v48 }
 0x4d7   :  { %v1464_v51 = vpop.f32.mrf.mxu0 }
 0x4d8   :  { %1210 = vst [vmem:[#allocation3] sm:$0x1] %v1205_v50 }
 0x4d9   :  { %v1207_v40 = vpop.f32.mrf.mxu0 }
 0x4da   :  { %1516 = shalt.err (!%p1513_p4)
}
 0x4db   :  { %1220 = dma.vmem_to_hbm [thread:$0]  %s1218_s22, 16, %s1977_s11, [#allocation4]   ;;  %v1465_v3 = vpop.f32.mrf.mxu0 }
 0x4dc   :  { %1525 = dma.done.wait [#allocation4], 16  }
 0x4dd   :  { %1526 = vsyncadd [#allocation4], 4294967280 }
 0x4de   :  { %1224 = vsyncpa [#allocation4], 1 }

</bundles_post_ra>
